<compile_context>
chip_gen: v5e
topology: v5e:2x2
jax: 0.10.0
libtpu: 0.0.40
codegen_flags: <defaults>
</compile_context>

<pallas_src>
import jax
import jax.numpy as jnp
from jax.experimental import pallas as pl
from jax.experimental.pallas import tpu as pltpu


def _decoder_mlp_kernel(x_ref, w1_ref, b1_ref, w2_ref, b2_ref, w3_ref, b3_ref,
                        o_ref):
    """Fused 3-layer MLP (ReLU, ReLU, Identity) on one row tile."""
    # bf16 operands feed the MXU at native rate (no-op if x is already bf16);
    # accumulate + bias + ReLU in f32.
    x = x_ref[...].astype(jnp.bfloat16)

    h = jnp.dot(x, w1_ref[...], preferred_element_type=jnp.float32) + b1_ref[...]
    h = jnp.maximum(h, 0.0)

    h = jnp.dot(h.astype(jnp.bfloat16), w2_ref[...],
                preferred_element_type=jnp.float32) + b2_ref[...]
    h = jnp.maximum(h, 0.0)

    # NOTE (v5e only): if a bundle dump shows the vmatmul slot binding, this
    # N=2 projection could move to VPU+XLU (broadcast-mul + lane reduce).
    # On v6e/v7x the kernel is HBM-bound, so the MXU dot is kept.
    y = jnp.dot(h.astype(jnp.bfloat16), w3_ref[...],
                preferred_element_type=jnp.float32) + b3_ref[...]
    o_ref[...] = y.astype(o_ref.dtype)


def _num_tensorcores():
    """2 on v7x (megacore sharding of the 'parallel' grid axis), else 1."""
    try:
        kind = jax.devices()[0].device_kind.lower()
    except Exception:  # pragma: no cover - be robust on exotic backends
        return 1
    return 2 if ("v7" in kind or "7x" in kind) else 1


def _round_up8(n):
    return max(8, ((int(n) + 7) // 8) * 8)


def decoder_forward(x, params, *, tile_rows=None, max_tile_rows=4096):
    """Pallas equivalent of Decoder.forward (the node MLP)."""
    n_rows, in_dim = x.shape
    out_dim = params["w3"].shape[1]
    num_tc = _num_tensorcores()

    # ----- choose the row tile (generation-aware, no padding) --------------
    if tile_rows is None:
        if num_tc == 1 and n_rows <= max_tile_rows:
            # Single TensorCore + small input: one block equal to the full
            # array (legal even when n_rows % 8 != 0) -> no ragged handling,
            # no extra grid step.
            tile_rows = n_rows
        else:
            # Balanced grid: n_tiles ~= n_groups * num_tc (a multiple of the
            # TC count on v7x), tiles near-equal and <= max_tile_rows.
            n_groups = max(1, pl.cdiv(n_rows, max_tile_rows * num_tc))
            tile_rows = _round_up8(pl.cdiv(n_rows, n_groups * num_tc))
    else:
        tile_rows = int(tile_rows)
        tile_rows = n_rows if tile_rows >= n_rows else _round_up8(tile_rows)

    n_tiles = pl.cdiv(n_rows, tile_rows)

    # ----- params: bf16 weights (MXU operands, tiny), f32 biases ------------
    w1 = params["w1"].astype(jnp.bfloat16)
    w2 = params["w2"].astype(jnp.bfloat16)
    w3 = params["w3"].astype(jnp.bfloat16)
    b1 = params["b1"].reshape(1, -1).astype(jnp.float32)
    b2 = params["b2"].reshape(1, -1).astype(jnp.float32)
    b3 = params["b3"].reshape(1, -1).astype(jnp.float32)

    full = lambda a: pl.BlockSpec(a.shape, lambda i: (0, 0))  # resident array

    out = pl.pallas_call(
        _decoder_mlp_kernel,
        out_shape=jax.ShapeDtypeStruct((n_rows, out_dim), x.dtype),
        grid_spec=pltpu.PrefetchScalarGridSpec(
            num_scalar_prefetch=0,
            grid=(n_tiles,),
            in_specs=[
                pl.BlockSpec((tile_rows, in_dim), lambda i: (i, 0)),
                full(w1), full(b1),
                full(w2), full(b2),
                full(w3), full(b3),
            ],
            out_specs=pl.BlockSpec((tile_rows, out_dim), lambda i: (i, 0)),
        ),
        compiler_params=pltpu.CompilerParams(
            dimension_semantics=("parallel",)),
    )(x, w1, b1, w2, b2, w3, b3)

    return out


def init_decoder_params(key, in_dim, hidden_dim, out_dim):
    """Deterministic init for Linear(in,h) -> Linear(h,h) -> Linear(h,out)."""
    ks = jax.random.split(key, 6)
    return {
        "w1": jax.random.normal(ks[0], (in_dim, hidden_dim), jnp.float32) * 0.1,
        "b1": jax.random.normal(ks[1], (hidden_dim,), jnp.float32) * 0.1,
        "w2": jax.random.normal(ks[2], (hidden_dim, hidden_dim), jnp.float32) * 0.1,
        "b2": jax.random.normal(ks[3], (hidden_dim,), jnp.float32) * 0.1,
        "w3": jax.random.normal(ks[4], (hidden_dim, out_dim), jnp.float32) * 0.1,
        "b3": jax.random.normal(ks[5], (out_dim,), jnp.float32) * 0.1,
    }


def _reference_decoder(x, p):
    h = jnp.maximum(x @ p["w1"] + p["b1"], 0.0)
    h = jnp.maximum(h @ p["w2"] + p["b2"], 0.0)
    return h @ p["w3"] + p["b3"]


if __name__ == "__main__":
    # Shapes consistent with Decoder(node_in=128, node_out=2,
    #                                mlp_num_layers=2, mlp_hidden_dim=128)
    num_nodes = 500            # deliberately NOT a multiple of 8 / tile size
    node_in, node_out, hidden = 128, 2, 128

    key = jax.random.PRNGKey(0)
    k_x, k_p = jax.random.split(key, 2)

    x = jax.random.normal(k_x, (num_nodes, node_in), jnp.float32)
    params = init_decoder_params(k_p, node_in, hidden, node_out)

    ref = _reference_decoder(x, params)

    # Default (generation-aware) tiling.
    out = decoder_forward(x, params)
    jax.block_until_ready(out)
    assert out.shape == ref.shape
    # Tolerance accounts for bf16 MXU operands with f32 accumulation.
    assert jnp.allclose(out, ref, atol=3e-2, rtol=3e-2), \
        float(jnp.max(jnp.abs(out - ref)))

    # Explicit small tile: exercises the multi-tile + ragged-last-block path
    # (500 = 3*128 + 116) that replaced the old jnp.pad round trip.
    out2 = decoder_forward(x, params, tile_rows=128)
    jax.block_until_ready(out2)
    assert jnp.allclose(out2, ref, atol=3e-2, rtol=3e-2), \
        float(jnp.max(jnp.abs(out2 - ref)))

    print("KERNEL_OK")
</pallas_src>

<mosaic_0001>
module attributes {stable_mosaic.version = 11 : i64} {
  func.func @_decoder_mlp_kernel(%arg0: i32, %arg1: memref<500x128xf32, #tpu.memory_space<vmem>>, %arg2: memref<128x128xbf16, #tpu.memory_space<vmem>>, %arg3: memref<1x128xf32, #tpu.memory_space<vmem>>, %arg4: memref<128x128xbf16, #tpu.memory_space<vmem>>, %arg5: memref<1x128xf32, #tpu.memory_space<vmem>>, %arg6: memref<128x2xbf16, #tpu.memory_space<vmem>>, %arg7: memref<1x2xf32, #tpu.memory_space<vmem>>, %arg8: memref<500x2xf32, #tpu.memory_space<vmem>>) attributes {dimension_semantics = [#tpu.dimension_semantics<parallel>], iteration_bounds = array<i64: 1>, scalar_prefetch = 0 : i64, scratch_operands = 0 : i64, tpu.core_type = #tpu.core_type<tc>, window_params = [{transform_indices = @transform_0, window_bounds = array<i64: 500, 128>}, {pipeline_mode = #tpu.pipeline_mode<synchronous>, transform_indices = @transform_1, window_bounds = array<i64: 128, 128>}, {pipeline_mode = #tpu.pipeline_mode<synchronous>, transform_indices = @transform_2, window_bounds = array<i64: 1, 128>}, {pipeline_mode = #tpu.pipeline_mode<synchronous>, transform_indices = @transform_3, window_bounds = array<i64: 128, 128>}, {pipeline_mode = #tpu.pipeline_mode<synchronous>, transform_indices = @transform_4, window_bounds = array<i64: 1, 128>}, {pipeline_mode = #tpu.pipeline_mode<synchronous>, transform_indices = @transform_5, window_bounds = array<i64: 128, 2>}, {pipeline_mode = #tpu.pipeline_mode<synchronous>, transform_indices = @transform_6, window_bounds = array<i64: 1, 2>}, {transform_indices = @transform_7, window_bounds = array<i64: 500, 2>}]} {
    %c0 = arith.constant 0 : index
    %c0_0 = arith.constant 0 : index
    %0 = vector.load %arg1[%c0, %c0_0] : memref<500x128xf32, #tpu.memory_space<vmem>>, vector<500x128xf32>
    %1 = arith.truncf %0 : vector<500x128xf32> to vector<500x128xbf16>
    %c0_1 = arith.constant 0 : index
    %c0_2 = arith.constant 0 : index
    %2 = vector.load %arg2[%c0_1, %c0_2] : memref<128x128xbf16, #tpu.memory_space<vmem>>, vector<128x128xbf16>
    %cst = arith.constant dense<0.000000e+00> : vector<500x128xf32>
    %3 = tpu.matmul %1, %2, %cst {dimension_numbers = #tpu.dot_dimension_numbers<[1], [0], [0], [1], [0, 0, 1, 1], [], []>} : vector<500x128xbf16>, vector<128x128xbf16>, vector<500x128xf32> -> vector<500x128xf32>
    %c0_3 = arith.constant 0 : index
    %c0_4 = arith.constant 0 : index
    %4 = vector.load %arg3[%c0_3, %c0_4] : memref<1x128xf32, #tpu.memory_space<vmem>>, vector<1x128xf32>
    %5 = vector.broadcast %4 : vector<1x128xf32> to vector<500x128xf32>
    %6 = arith.addf %3, %5 : vector<500x128xf32>
    %cst_5 = arith.constant 0.000000e+00 : f32
    %7 = vector.broadcast %cst_5 : f32 to vector<500x128xf32>
    %8 = arith.maximumf %6, %7 : vector<500x128xf32>
    %9 = arith.truncf %8 : vector<500x128xf32> to vector<500x128xbf16>
    %c0_6 = arith.constant 0 : index
    %c0_7 = arith.constant 0 : index
    %10 = vector.load %arg4[%c0_6, %c0_7] : memref<128x128xbf16, #tpu.memory_space<vmem>>, vector<128x128xbf16>
    %cst_8 = arith.constant dense<0.000000e+00> : vector<500x128xf32>
    %11 = tpu.matmul %9, %10, %cst_8 {dimension_numbers = #tpu.dot_dimension_numbers<[1], [0], [0], [1], [0, 0, 1, 1], [], []>} : vector<500x128xbf16>, vector<128x128xbf16>, vector<500x128xf32> -> vector<500x128xf32>
    %c0_9 = arith.constant 0 : index
    %c0_10 = arith.constant 0 : index
    %12 = vector.load %arg5[%c0_9, %c0_10] : memref<1x128xf32, #tpu.memory_space<vmem>>, vector<1x128xf32>
    %13 = vector.broadcast %12 : vector<1x128xf32> to vector<500x128xf32>
    %14 = arith.addf %11, %13 : vector<500x128xf32>
    %cst_11 = arith.constant 0.000000e+00 : f32
    %15 = vector.broadcast %cst_11 : f32 to vector<500x128xf32>
    %16 = arith.maximumf %14, %15 : vector<500x128xf32>
    %17 = arith.truncf %16 : vector<500x128xf32> to vector<500x128xbf16>
    %c0_12 = arith.constant 0 : index
    %c0_13 = arith.constant 0 : index
    %18 = vector.load %arg6[%c0_12, %c0_13] : memref<128x2xbf16, #tpu.memory_space<vmem>>, vector<128x2xbf16>
    %cst_14 = arith.constant dense<0.000000e+00> : vector<500x2xf32>
    %19 = tpu.matmul %17, %18, %cst_14 {dimension_numbers = #tpu.dot_dimension_numbers<[1], [0], [0], [1], [0, 0, 1, 1], [], []>} : vector<500x128xbf16>, vector<128x2xbf16>, vector<500x2xf32> -> vector<500x2xf32>
    %c0_15 = arith.constant 0 : index
    %c0_16 = arith.constant 0 : index
    %20 = vector.load %arg7[%c0_15, %c0_16] : memref<1x2xf32, #tpu.memory_space<vmem>>, vector<1x2xf32>
    %21 = vector.broadcast %20 : vector<1x2xf32> to vector<500x2xf32>
    %22 = arith.addf %19, %21 : vector<500x2xf32>
    %c0_17 = arith.constant 0 : index
    %c0_18 = arith.constant 0 : index
    %23 = vector.load %arg8[%c0_17, %c0_18] : memref<500x2xf32, #tpu.memory_space<vmem>>, vector<500x2xf32>
    tpu.vector_store %arg8[%c0_17, %c0_18], %22 {strides = array<i32>} : memref<500x2xf32, #tpu.memory_space<vmem>>, vector<500x2xf32>,
    return
  }
  func.func @transform_0(%arg0: i32) -> (i32, i32) {
    %c0_i32 = arith.constant 0 : i32
    %c0_i32_0 = arith.constant 0 : i32
    return %arg0, %c0_i32 : i32, i32
  }
  func.func @transform_1(%arg0: i32) -> (i32, i32) {
    %c0_i32 = arith.constant 0 : i32
    %c0_i32_0 = arith.constant 0 : i32
    %c0_i32_1 = arith.constant 0 : i32
    return %c0_i32, %c0_i32_0 : i32, i32
  }
  func.func @transform_2(%arg0: i32) -> (i32, i32) {
    %c0_i32 = arith.constant 0 : i32
    %c0_i32_0 = arith.constant 0 : i32
    %c0_i32_1 = arith.constant 0 : i32
    return %c0_i32, %c0_i32_0 : i32, i32
  }
  func.func @transform_3(%arg0: i32) -> (i32, i32) {
    %c0_i32 = arith.constant 0 : i32
    %c0_i32_0 = arith.constant 0 : i32
    %c0_i32_1 = arith.constant 0 : i32
    return %c0_i32, %c0_i32_0 : i32, i32
  }
  func.func @transform_4(%arg0: i32) -> (i32, i32) {
    %c0_i32 = arith.constant 0 : i32
    %c0_i32_0 = arith.constant 0 : i32
    %c0_i32_1 = arith.constant 0 : i32
    return %c0_i32, %c0_i32_0 : i32, i32
  }
  func.func @transform_5(%arg0: i32) -> (i32, i32) {
    %c0_i32 = arith.constant 0 : i32
    %c0_i32_0 = arith.constant 0 : i32
    %c0_i32_1 = arith.constant 0 : i32
    return %c0_i32, %c0_i32_0 : i32, i32
  }
  func.func @transform_6(%arg0: i32) -> (i32, i32) {
    %c0_i32 = arith.constant 0 : i32
    %c0_i32_0 = arith.constant 0 : i32
    %c0_i32_1 = arith.constant 0 : i32
    return %c0_i32, %c0_i32_0 : i32, i32
  }
  func.func @transform_7(%arg0: i32) -> (i32, i32) {
    %c0_i32 = arith.constant 0 : i32
    %c0_i32_0 = arith.constant 0 : i32
    return %arg0, %c0_i32 : i32, i32
  }
}

</mosaic_0001>

<bundles_post_ra>
// kernel: tpu_custom_call.1
= control target key start
LH: loop header
LB: loop body
LE: loop exit
PB: predicated region body
PF: predicated region fallthrough
CT: control target
= control target key end

     0   :  { %12 = vsyncpa [#allocation3], 0  ;;  %s1881_s0 = inlined_call_operand.hbm [shape: f32[500,128], index: 0, kind: input, shape index: {}]   ;;  %s1882_s1 = inlined_call_operand.vmem [shape: bf16[128,128], index: 1, kind: input, shape index: {}]   ;;  %s1883_s2 = inlined_call_operand.vmem [shape: f32[1,128], index: 2, kind: input, shape index: {}]   ;;  %s1884_s3 = inlined_call_operand.hbm [shape: bf16[128,128], index: 3, kind: input, shape index: {}]   ;;  %s1885_s4 = inlined_call_operand.vmem [shape: f32[1,128], index: 4, kind: input, shape index: {}]   ;;  %s1886_s5 = inlined_call_operand.vmem [shape: bf16[128,2], index: 5, kind: input, shape index: {}]   ;;  %s1887_s6 = inlined_call_operand.vmem [shape: f32[1,2], index: 6, kind: input, shape index: {}]   ;;  %s1888_s7 = inlined_call_operand.vmem [shape: f32[500,2], index: 7, kind: output, shape index: {}]  }
   0x1   :  { %s18_s26 = sshll.u32 %s1881_s0, 4  ;;  %s19_s26 = int_to_ptr.hbm [resolvable:$true] %s18_s26 }
   0x2   :  { %13 = vsyncpa [#allocation5], 0  ;;  %s1329_s27 = smov [#allocation2]   ;;  %s35_s8 = sshll.u32 %s1884_s3, 4  ;;  %s36_s8 = int_to_ptr.hbm [resolvable:$true] %s35_s8 }
   0x3   :  { %s20_s28 = sshll.u32 %s1329_s27, 4  ;;  %s1330_s9 = smov 128   ;;  %s21_s28 = int_to_ptr.vmem [resolvable:$true] %s20_s28 }
   0x4   :  { %s1331_s10 = smov 8   ;;  %s1332_s11 = smov [#allocation4]  }
   0x5   :  { %26 = dma.hbm_to_vmem [thread:$0]  %s19_s26, 8064, %s21_s28, [#allocation3], %s1330_s9, %s1330_s9, %s1331_s10  }
   0x6   :  { %s37_s12 = sshll.u32 %s1332_s11, 4  ;;  %s1333_s13 = smov 64   ;;  %s38_s12 = int_to_ptr.vmem [resolvable:$true] %s37_s12 }
   0x7   :  { %s1334_s14 = smov 4  }
   0x8   :  { %43 = dma.hbm_to_vmem [thread:$0]  %s36_s8, 1024, %s38_s12, [#allocation5], %s1333_s13, %s1333_s13, %s1334_s14  }
   0x9   :  { %1325 = dma.done.wait [#allocation3], 8064  }
   0xa   :  { %1326 = vsyncadd [#allocation3], 4294959232 }
   0xb   :  { %1327 = dma.done.wait [#allocation5], 1024  }
   0xc   :  { %1328 = vsyncadd [#allocation5], 4294966272  ;;  %v1225_v0 = vld [vmem:[%s1882_s1 + $0x38] sm:$0xff]  ;;  %v1224_v1 = vld [vmem:[%s1882_s1 + $0x30] sm:$0xff]  ;;  %vm1051_vm0 = vcmask 15360   ;;  %vm1114_vm1 = vcmask 11264  }
   0xd   :  { %221 = vmatpush.bf16.msra.mxu0 %v1225_v0  ;;  %1242 = vmatpush.bf16.msra.mxu3 %v1225_v0  ;;  %v1223_v2 = vld [vmem:[%s1882_s1 + $0x28] sm:$0xff]  ;;  %v1222_v3 = vld [vmem:[%s1882_s1 + $0x20] sm:$0xff]  ;;  %v1221_v4 = vld [vmem:[%s1882_s1 + $0x18] sm:$0xff] }
   0xe   :  { %v1220_v5 = vld [vmem:[%s1882_s1 + $0x10] sm:$0xff]  ;;  %v1219_v6 = vld [vmem:[%s1882_s1 + $0x8] sm:$0xff]  ;;  %v1218_v7 = vld [vmem:[%s1882_s1] sm:$0xff] }
   0xf   :  { %v58_v8 = vld [vmem:[#allocation2] sm:$0xff]  ;;  %v59_v9 = vld [vmem:[#allocation2 + $0x8] sm:$0xff]  ;;  %v60_v11 = vld [vmem:[#allocation2 + $0x10] sm:$0xff] }
  0x10   :  { %v121_v10 = vpack.c.bf16 %v59_v9, %v58_v8  ;;  %v61_v12 = vld [vmem:[#allocation2 + $0x18] sm:$0xff]  ;;  %v62_v14 = vld [vmem:[#allocation2 + $0x20] sm:$0xff]  ;;  %v63_v15 = vld [vmem:[#allocation2 + $0x28] sm:$0xff] }
  0x11   :  { %222 = vmatpush.bf16.msra.mxu0 %v1224_v1  ;;  %1243 = vmatpush.bf16.msra.mxu3 %v1224_v1  ;;  %v122_v13 = vpack.c.bf16 %v61_v12, %v60_v11  ;;  %v123_v16 = vpack.c.bf16 %v63_v15, %v62_v14  ;;  %v64_v17 = vld [vmem:[#allocation2 + $0x30] sm:$0xff]  ;;  %v65_v18 = vld [vmem:[#allocation2 + $0x38] sm:$0xff]  ;;  %v66_v20 = vld [vmem:[#allocation2 + $0x40] sm:$0xff] }
  0x12   :  { %v124_v19 = vpack.c.bf16 %v65_v18, %v64_v17  ;;  %v67_v21 = vld [vmem:[#allocation2 + $0x48] sm:$0xff]  ;;  %v1233_v23 = vld [vmem:[#allocation4 + $0x38] sm:$0xff]  ;;  %v69_v25 = vld [vmem:[#allocation2 + $0x58] sm:$0xff] }
  0x13   :  { %v125_v22 = vpack.c.bf16 %v67_v21, %v66_v20  ;;  %552 = vmatpush.bf16.msra.mxu1 %v1233_v23  ;;  %v68_v24 = vld [vmem:[#allocation2 + $0x50] sm:$0xff]  ;;  %v1232_v27 = vld [vmem:[#allocation4 + $0x30] sm:$0xff]  ;;  %v1231_v28 = vld [vmem:[#allocation4 + $0x28] sm:$0xff] }
  0x14   :  { %v126_v26 = vpack.c.bf16 %v69_v25, %v68_v24  ;;  %v1230_v29 = vld [vmem:[#allocation4 + $0x20] sm:$0xff]  ;;  %v70_v30 = vld [vmem:[#allocation2 + $0x60] sm:$0xff]  ;;  %v71_v31 = vld [vmem:[#allocation2 + $0x68] sm:$0xff] }
  0x15   :  { %223 = vmatpush.bf16.msra.mxu0 %v1223_v2  ;;  %1244 = vmatpush.bf16.msra.mxu3 %v1223_v2  ;;  %v1229_v32 = vld [vmem:[#allocation4 + $0x18] sm:$0xff]  ;;  %v127_v33 = vpack.c.bf16 %v71_v31, %v70_v30  ;;  %v1228_v34 = vld [vmem:[#allocation4 + $0x10] sm:$0xff]  ;;  %v1227_v35 = vld [vmem:[#allocation4 + $0x8] sm:$0xff] }
  0x16   :  { %v1226_v36 = vld [vmem:[#allocation4] sm:$0xff]  ;;  %v72_v37 = vld [vmem:[#allocation2 + $0x70] sm:$0xff]  ;;  %v74_v40 = vld [vmem:[#allocation2 + $0x80] sm:$0xff] }
  0x17   :  { %553 = vmatpush.bf16.msra.mxu1 %v1232_v27  ;;  %v73_v38 = vld [vmem:[#allocation2 + $0x78] sm:$0xff]  ;;  %v75_v41 = vld [vmem:[#allocation2 + $0x88] sm:$0xff]  ;;  %v1408_v44 = vld [vmem:[%s1883_s2] ss:$0 sm:$0xff] }
  0x18   :  { %v128_v39 = vpack.c.bf16 %v73_v38, %v72_v37  ;;  %v129_v42 = vpack.c.bf16 %v75_v41, %v74_v40  ;;  %v76_v50 = vld [vmem:[#allocation2 + $0x90] sm:$0xff]  ;;  %v77_v51 = vld [vmem:[#allocation2 + $0x98] sm:$0xff]  ;;  %v78_v60 = vld [vmem:[#allocation2 + $0xa0] sm:$0xff] }
  0x19   :  { %224 = vmatpush.bf16.msra.mxu0 %v1222_v3  ;;  %1245 = vmatpush.bf16.msra.mxu3 %v1222_v3  ;;  %v130_v53 = vpack.c.bf16 %v77_v51, %v76_v50  ;;  %v79_v61 = vld [vmem:[#allocation2 + $0xa8] sm:$0xff]  ;;  %v106_v20 = vld [vmem:[#allocation2 + $0x180] sm:$0xff]  ;;  %v85_v30 = vld [vmem:[#allocation2 + $0xd8] sm:$0xff] }
  0x1a   :  { %v131_v63 = vpack.c.bf16 %v79_v61, %v78_v60  ;;  %v83_v17 = vld [vmem:[#allocation2 + $0xc8] sm:$0xff]  ;;  %v1241_v40 = vld [vmem:[%s1886_s5 + $0x38] sm:$0xff]  ;;  %v88_v61 = vld [vmem:[#allocation2 + $0xf0] sm:$0xff] }
  0x1b   :  { %554 = vmatpush.bf16.msra.mxu1 %v1231_v28  ;;  %v107_v21 = vld [vmem:[#allocation2 + $0x188] sm:$0xff]  ;;  %883 = vmatpush.bf16.msra.mxu2 %v1241_v40 }
  0x1c   :  { %v111_v50 = vld [vmem:[#allocation2 + $0x1a8] sm:$0xff] }
  0x1d   :  { %225 = vmatpush.bf16.msra.mxu0 %v1221_v4  ;;  %1246 = vmatpush.bf16.msra.mxu3 %v1221_v4 }
  0x1f   :  { %555 = vmatpush.bf16.msra.mxu1 %v1230_v29 }
  0x21   :  { %226 = vmatpush.bf16.msra.mxu0 %v1220_v5  ;;  %1247 = vmatpush.bf16.msra.mxu3 %v1220_v5 }
  0x23   :  { %556 = vmatpush.bf16.msra.mxu1 %v1229_v32 }
  0x25   :  { %227 = vmatpush.bf16.msra.mxu0 %v1219_v6  ;;  %1248 = vmatpush.bf16.msra.mxu3 %v1219_v6  ;;  %v80_v6 = vld [vmem:[#allocation2 + $0xb0] sm:$0xff] }
  0x27   :  { %557 = vmatpush.bf16.msra.mxu1 %v1228_v34 }
  0x29   :  { %228 = vmatpush.bf16.msra.mxu0 %v1218_v7  ;;  %1249 = vmatpush.bf16.msra.mxu3 %v1218_v7  ;;  %v81_v7 = vld [vmem:[#allocation2 + $0xb8] sm:$0xff] }
  0x2a   :  { %v132_v9 = vpack.c.bf16 %v81_v7, %v80_v6  ;;  %v1235_v6 = vld [vmem:[%s1886_s5 + $0x8] sm:$0xff]  ;;  %v1234_v7 = vld [vmem:[%s1886_s5] sm:$0xff] }
  0x2b   :  { %558 = vmatpush.bf16.msra.mxu1 %v1227_v35 }
  0x2c   :  { %229 = vmatmul.bf16.vlgmr.msra.gmra.mxu0 %v121_v10 }
  0x2d   :  { %1250 = vmatpush.bf16.msrb.mxu3 %v1233_v23  ;;  %v145_v23 = vpack.c.bf16 %v107_v21, %v106_v20 }
  0x2f   :  { %559 = vmatpush.bf16.msra.mxu1 %v1226_v36  ;;  %349 = vmatmul.bf16.vlgmr.msra.gmra.mxu3 %v145_v23 }
  0x31   :  { %1251 = vmatpush.bf16.msrb.mxu3 %v1232_v27 }
  0x35   :  { %1252 = vmatpush.bf16.msrb.mxu3 %v1231_v28 }
  0x39   :  { %1253 = vmatpush.bf16.msrb.mxu3 %v1230_v29  ;;  %v84_v29 = vld [vmem:[#allocation2 + $0xd0] sm:$0xff] }
  0x3c   :  { %234 = vmatmul.bf16.gmra.mxu0 %v122_v13 }
  0x3d   :  { %1254 = vmatpush.bf16.msrb.mxu3 %v1229_v32  ;;  %v134_v32 = vpack.c.bf16 %v85_v30, %v84_v29  ;;  %v1455_v30 = vld [vmem:[%s1885_s4] ss:$0 sm:$0xff] }
  0x41   :  { %1255 = vmatpush.bf16.msrb.mxu3 %v1228_v34  ;;  %v109_v34 = vld [vmem:[#allocation2 + $0x198] sm:$0xff] }
  0x45   :  { %1256 = vmatpush.bf16.msrb.mxu3 %v1227_v35 }
  0x49   :  { %1257 = vmatpush.bf16.msrb.mxu3 %v1226_v36 }
  0x4c   :  { %239 = vmatmul.bf16.gmra.mxu0 %v123_v16  ;;  %v82_v16 = vld [vmem:[#allocation2 + $0xc0] sm:$0xff] }
  0x4d   :  { %1258 = vmatpush.bf16.msra.mxu3 %v1241_v40 }
  0x5c   :  { %244 = vmatmul.bf16.gmra.mxu0 %v124_v19  ;;  %v133_v19 = vpack.c.bf16 %v83_v17, %v82_v16  ;;  %v114_v17 = vld [vmem:[#allocation2 + $0x1c0] sm:$0xff] }
  0x6c   :  { %249 = vmatmul.bf16.gmra.mxu0 %v125_v22 }
  0x7c   :  { %254 = vmatmul.bf16.gmra.mxu0 %v126_v26 }
  0x8c   :  { %259 = vmatmul.bf16.gmra.mxu0 %v127_v33  ;;  %v108_v33 = vld [vmem:[#allocation2 + $0x190] sm:$0xff] }
  0x8d   :  { %v146_v36 = vpack.c.bf16 %v109_v34, %v108_v33  ;;  %v117_v33 = vld [vmem:[#allocation2 + $0x1d8] sm:$0xff] }
  0x8f   :  { %354 = vmatmul.bf16.gmra.mxu3 %v146_v36 }
  0x9c   :  { %264 = vmatmul.bf16.gmra.mxu0 %v128_v39 }
  0xa9   :  { %v230_v43 = vpop.f32.mrf.mxu0 }
  0xaa   :  { %v231_v45 = vadd.f32 %v1408_v44, %v230_v43  ;;  %v86_v43 = vld [vmem:[#allocation2 + $0xe0] sm:$0xff] }
  0xac   :  { %269 = vmatmul.bf16.gmra.mxu0 %v129_v42  ;;  %v389_v48 = vmax.f32 %v231_v45, 0.0  ;;  %v87_v45 = vld [vmem:[#allocation2 + $0xe8] sm:$0xff] }
  0xb1   :  { %v232_v46 = vpop.f32.mrf.mxu0 }
  0xb2   :  { %v233_v47 = vadd.f32 %v1408_v44, %v232_v46 }
  0xb4   :  { %v390_v49 = vmax.f32 %v233_v47, 0.0  ;;  %v1240_v47 = vld [vmem:[%s1886_s5 + $0x30] sm:$0xff] }
  0xb5   :  { %884 = vmatpush.bf16.msra.mxu2 %v1240_v47  ;;  %1259 = vmatpush.bf16.msra.mxu3 %v1240_v47 }
  0xb6   :  { %v452_v52 = vpack.c.bf16 %v390_v49, %v389_v48  ;;  %v135_v48 = vpack.c.bf16 %v87_v45, %v86_v43  ;;  %v110_v49 = vld [vmem:[#allocation2 + $0x1a0] sm:$0xff] }
  0xb8   :  { %560 = vmatmul.bf16.vlgmr.msra.gmra.mxu1 %v452_v52  ;;  %v147_v52 = vpack.c.bf16 %v111_v50, %v110_v49  ;;  %v94_v49 = vld [vmem:[#allocation2 + $0x120] sm:$0xff]  ;;  %v95_v50 = vld [vmem:[#allocation2 + $0x128] sm:$0xff] }
  0xb9   :  { %v235_v54 = vpop.f32.mrf.mxu0 }
  0xba   :  { %v236_v55 = vadd.f32 %v1408_v44, %v235_v54  ;;  %359 = vmatmul.bf16.gmra.mxu3 %v147_v52  ;;  %v1238_v54 = vld [vmem:[%s1886_s5 + $0x20] sm:$0xff]  ;;  %v139_v52 = vpack.c.bf16 %v95_v50, %v94_v49 }
  0xbc   :  { %274 = vmatmul.bf16.gmra.mxu0 %v130_v53  ;;  %v391_v58 = vmax.f32 %v236_v55, 0.0  ;;  %v1239_v53 = vld [vmem:[%s1886_s5 + $0x28] sm:$0xff] }
  0xbd   :  { %885 = vmatpush.bf16.msra.mxu2 %v1239_v53  ;;  %1260 = vmatpush.bf16.msra.mxu3 %v1239_v53  ;;  %v118_v53 = vld [vmem:[#allocation2 + $0x1e0] sm:$0xff] }
  0xc1   :  { %v237_v56 = vpop.f32.mrf.mxu0  ;;  %886 = vmatpush.bf16.msra.mxu2 %v1238_v54  ;;  %1261 = vmatpush.bf16.msra.mxu3 %v1238_v54  ;;  %v119_v54 = vld [vmem:[#allocation2 + $0x1e8] sm:$0xff] }
  0xc2   :  { %v238_v57 = vadd.f32 %v1408_v44, %v237_v56 }
  0xc4   :  { %v392_v59 = vmax.f32 %v238_v57, 0.0 }
  0xc6   :  { %v453_v62 = vpack.c.bf16 %v392_v59, %v391_v58  ;;  %v1237_v58 = vld [vmem:[%s1886_s5 + $0x18] sm:$0xff] }
  0xc7   :  { %887 = vmatpush.bf16.msra.mxu2 %v1237_v58  ;;  %1262 = vmatpush.bf16.msra.mxu3 %v1237_v58 }
  0xc8   :  { %565 = vmatmul.bf16.gmra.mxu1 %v453_v62  ;;  %v89_v62 = vld [vmem:[#allocation2 + $0xf8] sm:$0xff] }
  0xc9   :  { %v240_v0 = vpop.f32.mrf.mxu0 }
  0xca   :  { %v241_v1 = vadd.f32 %v1408_v44, %v240_v0  ;;  %v1236_v0 = vld [vmem:[%s1886_s5 + $0x10] sm:$0xff] }
  0xcb   :  { %888 = vmatpush.bf16.msra.mxu2 %v1236_v0  ;;  %1263 = vmatpush.bf16.msra.mxu3 %v1236_v0 }
  0xcc   :  { %279 = vmatmul.bf16.gmra.mxu0 %v131_v63  ;;  %v393_v4 = vmax.f32 %v241_v1, 0.0  ;;  %v136_v1 = vpack.c.bf16 %v89_v62, %v88_v61 }
  0xcf   :  { %889 = vmatpush.bf16.msra.mxu2 %v1235_v6  ;;  %1264 = vmatpush.bf16.msra.mxu3 %v1235_v6  ;;  %v97_v6 = vld [vmem:[#allocation2 + $0x138] sm:$0xff] }
  0xd1   :  { %v242_v2 = vpop.f32.mrf.mxu0 }
  0xd2   :  { %v243_v3 = vadd.f32 %v1408_v44, %v242_v2  ;;  %v112_v2 = vld [vmem:[#allocation2 + $0x1b0] sm:$0xff] }
  0xd3   :  { %890 = vmatpush.bf16.msra.mxu2 %v1234_v7  ;;  %1265 = vmatpush.bf16.msra.mxu3 %v1234_v7 }
  0xd4   :  { %v394_v5 = vmax.f32 %v243_v3, 0.0  ;;  %v113_v3 = vld [vmem:[#allocation2 + $0x1b8] sm:$0xff] }
  0xd6   :  { %v454_v8 = vpack.c.bf16 %v394_v5, %v393_v4  ;;  %v148_v5 = vpack.c.bf16 %v113_v3, %v112_v2 }
  0xd8   :  { %570 = vmatmul.bf16.gmra.mxu1 %v454_v8  ;;  %364 = vmatmul.bf16.gmra.mxu3 %v148_v5  ;;  %v96_v5 = vld [vmem:[#allocation2 + $0x130] sm:$0xff] }
  0xd9   :  { %v245_v10 = vpop.f32.mrf.mxu0 }
  0xda   :  { %v246_v11 = vadd.f32 %v1408_v44, %v245_v10 }
  0xdc   :  { %284 = vmatmul.bf16.gmra.mxu0 %v132_v9  ;;  %v395_v14 = vmax.f32 %v246_v11, 0.0 }
  0xe1   :  { %v247_v12 = vpop.f32.mrf.mxu0 }
  0xe2   :  { %v248_v13 = vadd.f32 %v1408_v44, %v247_v12 }
  0xe4   :  { %v396_v15 = vmax.f32 %v248_v13, 0.0  ;;  %v90_v13 = vld [vmem:[#allocation2 + $0x100] sm:$0xff] }
  0xe6   :  { %v455_v18 = vpack.c.bf16 %v396_v15, %v395_v14  ;;  %v91_v14 = vld [vmem:[#allocation2 + $0x108] sm:$0xff] }
  0xe7   :  { %v137_v16 = vpack.c.bf16 %v91_v14, %v90_v13 }
  0xe8   :  { %575 = vmatmul.bf16.gmra.mxu1 %v455_v18  ;;  %v115_v18 = vld [vmem:[#allocation2 + $0x1c8] sm:$0xff] }
  0xe9   :  { %v250_v22 = vpop.f32.mrf.mxu0  ;;  %v149_v20 = vpack.c.bf16 %v115_v18, %v114_v17 }
  0xea   :  { %v251_v24 = vadd.f32 %v1408_v44, %v250_v22 }
  0xeb   :  { %369 = vmatmul.bf16.gmra.mxu3 %v149_v20 }
  0xec   :  { %289 = vmatmul.bf16.gmra.mxu0 %v133_v19  ;;  %v397_v27 = vmax.f32 %v251_v24, 0.0 }
  0xf1   :  { %v252_v25 = vpop.f32.mrf.mxu0 }
  0xf2   :  { %v253_v26 = vadd.f32 %v1408_v44, %v252_v25 }
  0xf4   :  { %v398_v28 = vmax.f32 %v253_v26, 0.0 }
  0xf6   :  { %v456_v31 = vpack.c.bf16 %v398_v28, %v397_v27  ;;  %v92_v27 = vld [vmem:[#allocation2 + $0x110] sm:$0xff]  ;;  %v93_v28 = vld [vmem:[#allocation2 + $0x118] sm:$0xff] }
  0xf8   :  { %580 = vmatmul.bf16.gmra.mxu1 %v456_v31  ;;  %v138_v31 = vpack.c.bf16 %v93_v28, %v92_v27  ;;  %v120_v27 = vld [vmem:[#allocation2 + $0x1f0] sm:$0xf] }
  0xf9   :  { %v255_v35 = vpop.f32.mrf.mxu0  ;;  %v152_v28 = vpack.c.bf16 %v120_v27, %v120_v27 }
  0xfa   :  { %v256_v37 = vadd.f32 %v1408_v44, %v255_v35 }
  0xfc   :  { %294 = vmatmul.bf16.gmra.mxu0 %v134_v32  ;;  %v399_v41 = vmax.f32 %v256_v37, 0.0  ;;  %v116_v32 = vld [vmem:[#allocation2 + $0x1d0] sm:$0xff] }
  0xfd   :  { %v150_v35 = vpack.c.bf16 %v117_v33, %v116_v32  ;;  %v350_v33 = vpop.f32.mrf.mxu3 }
  0xff   :  { %374 = vmatmul.bf16.gmra.mxu3 %v150_v35 }
 0x101   :  { %v257_v38 = vpop.f32.mrf.mxu0 }
 0x102   :  { %v258_v39 = vadd.f32 %v1408_v44, %v257_v38 }
 0x104   :  { %v400_v42 = vmax.f32 %v258_v39, 0.0 }
 0x106   :  { %v457_v46 = vpack.c.bf16 %v400_v42, %v399_v41 }
 0x108   :  { %585 = vmatmul.bf16.gmra.mxu1 %v457_v46 }
 0x109   :  { %v260_v51 = vpop.f32.mrf.mxu0 }
 0x10a   :  { %v261_v55 = vadd.f32 %v1408_v44, %v260_v51 }
 0x10c   :  { %299 = vmatmul.bf16.gmra.mxu0 %v135_v48  ;;  %v401_v59 = vmax.f32 %v261_v55, 0.0 }
 0x111   :  { %v262_v56 = vpop.f32.mrf.mxu0 }
 0x112   :  { %v263_v57 = vadd.f32 %v1408_v44, %v262_v56  ;;  %v151_v56 = vpack.c.bf16 %v119_v54, %v118_v53 }
 0x114   :  { %v402_v60 = vmax.f32 %v263_v57, 0.0  ;;  %379 = vmatmul.bf16.gmra.mxu3 %v151_v56 }
 0x116   :  { %v458_v63 = vpack.c.bf16 %v402_v60, %v401_v59 }
 0x118   :  { %590 = vmatmul.bf16.gmra.mxu1 %v458_v63 }
 0x119   :  { %v265_v4 = vpop.f32.mrf.mxu0 }
 0x11a   :  { %v266_v8 = vadd.f32 %v1408_v44, %v265_v4 }
 0x11c   :  { %304 = vmatmul.bf16.gmra.mxu0 %v136_v1  ;;  %v403_v11 = vmax.f32 %v266_v8, 0.0  ;;  %v140_v8 = vpack.c.bf16 %v97_v6, %v96_v5  ;;  %v102_v5 = vld [vmem:[#allocation2 + $0x160] sm:$0xff]  ;;  %v103_v6 = vld [vmem:[#allocation2 + $0x168] sm:$0xff] }
 0x121   :  { %v267_v9 = vpop.f32.mrf.mxu0 }
 0x122   :  { %v268_v10 = vadd.f32 %v1408_v44, %v267_v9 }
 0x124   :  { %v404_v12 = vmax.f32 %v268_v10, 0.0  ;;  %384 = vmatmul.bf16.gmra.mxu3 %v152_v28 }
 0x126   :  { %v459_v15 = vpack.c.bf16 %v404_v12, %v403_v11 }
 0x128   :  { %595 = vmatmul.bf16.gmra.mxu1 %v459_v15 }
 0x129   :  { %v270_v19 = vpop.f32.mrf.mxu0 }
 0x12a   :  { %v271_v21 = vadd.f32 %v1408_v44, %v270_v19 }
 0x12c   :  { %309 = vmatmul.bf16.gmra.mxu0 %v137_v16  ;;  %v405_v24 = vmax.f32 %v271_v21, 0.0 }
 0x131   :  { %v272_v22 = vpop.f32.mrf.mxu0 }
 0x132   :  { %v273_v23 = vadd.f32 %v1408_v44, %v272_v22  ;;  %v98_v22 = vld [vmem:[#allocation2 + $0x140] sm:$0xff] }
 0x134   :  { %v406_v25 = vmax.f32 %v273_v23, 0.0  ;;  %v99_v23 = vld [vmem:[#allocation2 + $0x148] sm:$0xff] }
 0x135   :  { %v561_v26 = vpop.f32.mrf.mxu1 }
 0x136   :  { %v460_v29 = vpack.c.bf16 %v406_v25, %v405_v24  ;;  %v562_v36 = vadd.f32 %v1455_v30, %v561_v26  ;;  %v141_v25 = vpack.c.bf16 %v99_v23, %v98_v22 }
 0x138   :  { %600 = vmatmul.bf16.gmra.mxu1 %v460_v29  ;;  %v720_v39 = vmax.f32 %v562_v36, 0.0 }
 0x139   :  { %v275_v34 = vpop.f32.mrf.mxu0 }
 0x13a   :  { %v276_v40 = vadd.f32 %v1408_v44, %v275_v34 }
 0x13c   :  { %314 = vmatmul.bf16.gmra.mxu0 %v138_v31  ;;  %v407_v46 = vmax.f32 %v276_v40, 0.0  ;;  %v351_v40 = vadd.f32 %v1408_v44, %v350_v33 }
 0x13d   :  { %v563_v37 = vpop.f32.mrf.mxu1 }
 0x13e   :  { %v564_v38 = vadd.f32 %v1455_v30, %v563_v37  ;;  %v437_v49 = vmax.f32 %v351_v40, 0.0 }
 0x140   :  { %v721_v41 = vmax.f32 %v564_v38, 0.0 }
 0x141   :  { %v277_v42 = vpop.f32.mrf.mxu0 }
 0x142   :  { %v278_v43 = vadd.f32 %v1408_v44, %v277_v42  ;;  %v783_v45 = vpack.c.bf16 %v721_v41, %v720_v39 }
 0x144   :  { %v408_v47 = vmax.f32 %v278_v43, 0.0  ;;  %891 = vmatmul.bf16.vlgmr.msra.gmra.mxu2 %v783_v45  ;;  %v100_v45 = vld [vmem:[#allocation2 + $0x150] sm:$0xff] }
 0x145   :  { %v566_v48 = vpop.f32.mrf.mxu1 }
 0x146   :  { %v461_v51 = vpack.c.bf16 %v408_v47, %v407_v46  ;;  %v567_v57 = vadd.f32 %v1455_v30, %v566_v48  ;;  %v101_v46 = vld [vmem:[#allocation2 + $0x158] sm:$0xff]  ;;  %v352_v48 = vpop.f32.mrf.mxu3 }
 0x147   :  { %v353_v50 = vadd.f32 %v1408_v44, %v352_v48 }
 0x148   :  { %605 = vmatmul.bf16.gmra.mxu1 %v461_v51  ;;  %v722_v60 = vmax.f32 %v567_v57, 0.0  ;;  %v142_v51 = vpack.c.bf16 %v101_v46, %v100_v45 }
 0x149   :  { %v280_v55 = vpop.f32.mrf.mxu0  ;;  %v438_v53 = vmax.f32 %v353_v50, 0.0 }
 0x14a   :  { %v281_v61 = vadd.f32 %v1408_v44, %v280_v55 }
 0x14b   :  { %v476_v54 = vpack.c.bf16 %v438_v53, %v437_v49 }
 0x14c   :  { %319 = vmatmul.bf16.gmra.mxu0 %v139_v52  ;;  %v409_v2 = vmax.f32 %v281_v61, 0.0 }
 0x14d   :  { %v568_v58 = vpop.f32.mrf.mxu1  ;;  %680 = vmatmul.bf16.vlgmr.msrb.gmra.mxu3 %v476_v54 }
 0x14e   :  { %v569_v59 = vadd.f32 %v1455_v30, %v568_v58  ;;  %v355_v58 = vpop.f32.mrf.mxu3 }
 0x150   :  { %v723_v62 = vmax.f32 %v569_v59, 0.0 }
 0x151   :  { %v282_v63 = vpop.f32.mrf.mxu0 }
 0x152   :  { %v283_v0 = vadd.f32 %v1408_v44, %v282_v63  ;;  %v784_v1 = vpack.c.bf16 %v723_v62, %v722_v60 }
 0x154   :  { %v410_v3 = vmax.f32 %v283_v0, 0.0  ;;  %896 = vmatmul.bf16.gmra.mxu2 %v784_v1  ;;  %v356_v1 = vadd.f32 %v1408_v44, %v355_v58 }
 0x155   :  { %v571_v4 = vpop.f32.mrf.mxu1 }
 0x156   :  { %v462_v7 = vpack.c.bf16 %v410_v3, %v409_v2  ;;  %v572_v10 = vadd.f32 %v1455_v30, %v571_v4 }
 0x158   :  { %610 = vmatmul.bf16.gmra.mxu1 %v462_v7  ;;  %v724_v13 = vmax.f32 %v572_v10, 0.0 }
 0x159   :  { %v285_v9 = vpop.f32.mrf.mxu0 }
 0x15a   :  { %v286_v14 = vadd.f32 %v1408_v44, %v285_v9  ;;  %v439_v9 = vmax.f32 %v356_v1, 0.0 }
 0x15c   :  { %324 = vmatmul.bf16.gmra.mxu0 %v140_v8  ;;  %v411_v19 = vmax.f32 %v286_v14, 0.0  ;;  %v357_v8 = vpop.f32.mrf.mxu3 }
 0x15d   :  { %v573_v11 = vpop.f32.mrf.mxu1  ;;  %v358_v10 = vadd.f32 %v1408_v44, %v357_v8 }
 0x15e   :  { %v574_v12 = vadd.f32 %v1455_v30, %v573_v11  ;;  %v143_v11 = vpack.c.bf16 %v103_v6, %v102_v5 }
 0x160   :  { %v725_v15 = vmax.f32 %v574_v12, 0.0 }
 0x161   :  { %v287_v16 = vpop.f32.mrf.mxu0 }
 0x162   :  { %v288_v17 = vadd.f32 %v1408_v44, %v287_v16  ;;  %v785_v18 = vpack.c.bf16 %v725_v15, %v724_v13  ;;  %v440_v13 = vmax.f32 %v358_v10, 0.0 }
 0x164   :  { %v412_v20 = vmax.f32 %v288_v17, 0.0  ;;  %901 = vmatmul.bf16.gmra.mxu2 %v785_v18  ;;  %v477_v14 = vpack.c.bf16 %v440_v13, %v439_v9  ;;  %v360_v18 = vpop.f32.mrf.mxu3 }
 0x165   :  { %v576_v21 = vpop.f32.mrf.mxu1 }
 0x166   :  { %v463_v24 = vpack.c.bf16 %v412_v20, %v411_v19  ;;  %v577_v29 = vadd.f32 %v1455_v30, %v576_v21  ;;  %685 = vmatmul.bf16.gmra.mxu3 %v477_v14 }
 0x168   :  { %615 = vmatmul.bf16.gmra.mxu1 %v463_v24  ;;  %v726_v34 = vmax.f32 %v577_v29, 0.0  ;;  %v104_v29 = vld [vmem:[#allocation2 + $0x170] sm:$0xff] }
 0x169   :  { %v290_v26 = vpop.f32.mrf.mxu0 }
 0x16a   :  { %v291_v35 = vadd.f32 %v1408_v44, %v290_v26 }
 0x16c   :  { %329 = vmatmul.bf16.gmra.mxu0 %v141_v25  ;;  %v413_v41 = vmax.f32 %v291_v35, 0.0  ;;  %v361_v25 = vadd.f32 %v1408_v44, %v360_v18  ;;  %v362_v33 = vpop.f32.mrf.mxu3 }
 0x16d   :  { %v578_v31 = vpop.f32.mrf.mxu1  ;;  %v363_v35 = vadd.f32 %v1408_v44, %v362_v33  ;;  %v1507_v33 = vld [vmem:[%s1887_s6] ss:$0 sm:$0xff] }
 0x16e   :  { %v579_v32 = vadd.f32 %v1455_v30, %v578_v31  ;;  %v105_v31 = vld [vmem:[#allocation2 + $0x178] sm:$0xff] }
 0x170   :  { %v727_v36 = vmax.f32 %v579_v32, 0.0 }
 0x171   :  { %v292_v37 = vpop.f32.mrf.mxu0 }
 0x172   :  { %v293_v38 = vadd.f32 %v1408_v44, %v292_v37  ;;  %v786_v39 = vpack.c.bf16 %v727_v36, %v726_v34  ;;  %v441_v34 = vmax.f32 %v361_v25, 0.0  ;;  %v144_v36 = vpack.c.bf16 %v105_v31, %v104_v29 }
 0x174   :  { %v414_v42 = vmax.f32 %v293_v38, 0.0  ;;  %906 = vmatmul.bf16.gmra.mxu2 %v786_v39  ;;  %v442_v38 = vmax.f32 %v363_v35, 0.0 }
 0x175   :  { %v581_v43 = vpop.f32.mrf.mxu1 }
 0x176   :  { %v464_v47 = vpack.c.bf16 %v414_v42, %v413_v41  ;;  %v582_v55 = vadd.f32 %v1455_v30, %v581_v43  ;;  %v478_v39 = vpack.c.bf16 %v442_v38, %v441_v34  ;;  %v365_v43 = vpop.f32.mrf.mxu3 }
 0x178   :  { %620 = vmatmul.bf16.gmra.mxu1 %v464_v47  ;;  %v728_v59 = vmax.f32 %v582_v55, 0.0  ;;  %690 = vmatmul.bf16.gmra.mxu3 %v478_v39 }
 0x179   :  { %v295_v52 = vpop.f32.mrf.mxu0 }
 0x17a   :  { %v296_v60 = vadd.f32 %v1408_v44, %v295_v52 }
 0x17c   :  { %334 = vmatmul.bf16.gmra.mxu0 %v142_v51  ;;  %v415_v2 = vmax.f32 %v296_v60, 0.0  ;;  %v366_v51 = vadd.f32 %v1408_v44, %v365_v43 }
 0x17d   :  { %v583_v56 = vpop.f32.mrf.mxu1 }
 0x17e   :  { %v584_v57 = vadd.f32 %v1455_v30, %v583_v56  ;;  %v367_v56 = vpop.f32.mrf.mxu3 }
 0x17f   :  { %v368_v58 = vadd.f32 %v1408_v44, %v367_v56 }
 0x180   :  { %v729_v61 = vmax.f32 %v584_v57, 0.0  ;;  %v443_v57 = vmax.f32 %v366_v51, 0.0 }
 0x181   :  { %v297_v62 = vpop.f32.mrf.mxu0  ;;  %v444_v60 = vmax.f32 %v368_v58, 0.0 }
 0x182   :  { %v298_v63 = vadd.f32 %v1408_v44, %v297_v62  ;;  %v787_v0 = vpack.c.bf16 %v729_v61, %v728_v59 }
 0x183   :  { %v479_v61 = vpack.c.bf16 %v444_v60, %v443_v57 }
 0x184   :  { %v416_v3 = vmax.f32 %v298_v63, 0.0  ;;  %911 = vmatmul.bf16.gmra.mxu2 %v787_v0 }
 0x185   :  { %v586_v4 = vpop.f32.mrf.mxu1 }
 0x186   :  { %v465_v7 = vpack.c.bf16 %v416_v3, %v415_v2  ;;  %v587_v15 = vadd.f32 %v1455_v30, %v586_v4  ;;  %v370_v1 = vpop.f32.mrf.mxu3 }
 0x187   :  { %v371_v8 = vadd.f32 %v1408_v44, %v370_v1 }
 0x188   :  { %625 = vmatmul.bf16.gmra.mxu1 %v465_v7  ;;  %v730_v19 = vmax.f32 %v587_v15, 0.0  ;;  %695 = vmatmul.bf16.gmra.mxu3 %v479_v61 }
 0x189   :  { %v300_v12 = vpop.f32.mrf.mxu0  ;;  %v445_v14 = vmax.f32 %v371_v8, 0.0 }
 0x18a   :  { %v301_v20 = vadd.f32 %v1408_v44, %v300_v12 }
 0x18c   :  { %339 = vmatmul.bf16.gmra.mxu0 %v143_v11  ;;  %v417_v26 = vmax.f32 %v301_v20, 0.0 }
 0x18d   :  { %v588_v16 = vpop.f32.mrf.mxu1 }
 0x18e   :  { %v589_v17 = vadd.f32 %v1455_v30, %v588_v16  ;;  %v372_v13 = vpop.f32.mrf.mxu3 }
 0x18f   :  { %v373_v15 = vadd.f32 %v1408_v44, %v372_v13 }
 0x190   :  { %v731_v21 = vmax.f32 %v589_v17, 0.0 }
 0x191   :  { %v302_v22 = vpop.f32.mrf.mxu0  ;;  %v446_v17 = vmax.f32 %v373_v15, 0.0 }
 0x192   :  { %v303_v23 = vadd.f32 %v1408_v44, %v302_v22  ;;  %v788_v24 = vpack.c.bf16 %v731_v21, %v730_v19 }
 0x193   :  { %v480_v18 = vpack.c.bf16 %v446_v17, %v445_v14 }
 0x194   :  { %v418_v27 = vmax.f32 %v303_v23, 0.0  ;;  %916 = vmatmul.bf16.gmra.mxu2 %v788_v24 }
 0x195   :  { %v591_v28 = vpop.f32.mrf.mxu1 }
 0x196   :  { %v466_v32 = vpack.c.bf16 %v418_v27, %v417_v26  ;;  %v592_v40 = vadd.f32 %v1455_v30, %v591_v28  ;;  %v375_v22 = vpop.f32.mrf.mxu3 }
 0x197   :  { %v376_v29 = vadd.f32 %v1408_v44, %v375_v22 }
 0x198   :  { %630 = vmatmul.bf16.gmra.mxu1 %v466_v32  ;;  %v732_v45 = vmax.f32 %v592_v40, 0.0  ;;  %700 = vmatmul.bf16.gmra.mxu3 %v480_v18 }
 0x199   :  { %v305_v37 = vpop.f32.mrf.mxu0  ;;  %v447_v38 = vmax.f32 %v376_v29, 0.0 }
 0x19a   :  { %v306_v46 = vadd.f32 %v1408_v44, %v305_v37 }
 0x19c   :  { %344 = vmatmul.bf16.gmra.mxu0 %v144_v36  ;;  %v419_v52 = vmax.f32 %v306_v46, 0.0 }
 0x19d   :  { %v593_v41 = vpop.f32.mrf.mxu1 }
 0x19e   :  { %v594_v42 = vadd.f32 %v1455_v30, %v593_v41  ;;  %v377_v36 = vpop.f32.mrf.mxu3 }
 0x19f   :  { %v378_v39 = vadd.f32 %v1408_v44, %v377_v36 }
 0x1a0   :  { %v733_v47 = vmax.f32 %v594_v42, 0.0 }
 0x1a1   :  { %v307_v48 = vpop.f32.mrf.mxu0  ;;  %v448_v42 = vmax.f32 %v378_v39, 0.0 }
 0x1a2   :  { %v308_v49 = vadd.f32 %v1408_v44, %v307_v48  ;;  %v789_v50 = vpack.c.bf16 %v733_v47, %v732_v45 }
 0x1a3   :  { %v481_v43 = vpack.c.bf16 %v448_v42, %v447_v38 }
 0x1a4   :  { %v420_v53 = vmax.f32 %v308_v49, 0.0  ;;  %921 = vmatmul.bf16.gmra.mxu2 %v789_v50 }
 0x1a5   :  { %v596_v54 = vpop.f32.mrf.mxu1 }
 0x1a6   :  { %v467_v55 = vpack.c.bf16 %v420_v53, %v419_v52  ;;  %v597_v62 = vadd.f32 %v1455_v30, %v596_v54  ;;  %v380_v48 = vpop.f32.mrf.mxu3 }
 0x1a7   :  { %v381_v57 = vadd.f32 %v1408_v44, %v380_v48 }
 0x1a8   :  { %635 = vmatmul.bf16.gmra.mxu1 %v467_v55  ;;  %v734_v2 = vmax.f32 %v597_v62, 0.0  ;;  %705 = vmatmul.bf16.gmra.mxu3 %v481_v43 }
 0x1a9   :  { %v310_v59 = vpop.f32.mrf.mxu0 }
 0x1aa   :  { %v311_v3 = vadd.f32 %v1408_v44, %v310_v59 }
 0x1ac   :  { %v421_v9 = vmax.f32 %v311_v3, 0.0 }
 0x1ad   :  { %v598_v63 = vpop.f32.mrf.mxu1 }
 0x1ae   :  { %v599_v0 = vadd.f32 %v1455_v30, %v598_v63  ;;  %v382_v62 = vpop.f32.mrf.mxu3 }
 0x1af   :  { %v383_v1 = vadd.f32 %v1408_v44, %v382_v62 }
 0x1b0   :  { %v735_v4 = vmax.f32 %v599_v0, 0.0  ;;  %v449_v0 = vmax.f32 %v381_v57, 0.0 }
 0x1b1   :  { %v312_v5 = vpop.f32.mrf.mxu0 }
 0x1b2   :  { %v313_v6 = vadd.f32 %v1408_v44, %v312_v5  ;;  %v790_v7 = vpack.c.bf16 %v735_v4, %v734_v2  ;;  %v450_v4 = vmax.f32 %v383_v1, 0.0 }
 0x1b4   :  { %v422_v10 = vmax.f32 %v313_v6, 0.0  ;;  %926 = vmatmul.bf16.gmra.mxu2 %v790_v7  ;;  %v482_v5 = vpack.c.bf16 %v450_v4, %v449_v0 }
 0x1b5   :  { %v601_v11 = vpop.f32.mrf.mxu1 }
 0x1b6   :  { %v468_v12 = vpack.c.bf16 %v422_v10, %v421_v9  ;;  %v602_v19 = vadd.f32 %v1455_v30, %v601_v11 }
 0x1b8   :  { %640 = vmatmul.bf16.gmra.mxu1 %v468_v12  ;;  %v736_v23 = vmax.f32 %v602_v19, 0.0  ;;  %710 = vmatmul.bf16.gmra.mxu3 %v482_v5 }
 0x1b9   :  { %v315_v16 = vpop.f32.mrf.mxu0 }
 0x1ba   :  { %v316_v24 = vadd.f32 %v1408_v44, %v315_v16 }
 0x1bc   :  { %v423_v31 = vmax.f32 %v316_v24, 0.0 }
 0x1bd   :  { %v603_v20 = vpop.f32.mrf.mxu1 }
 0x1be   :  { %v604_v21 = vadd.f32 %v1455_v30, %v603_v20 }
 0x1c0   :  { %v737_v25 = vmax.f32 %v604_v21, 0.0 }
 0x1c1   :  { %v317_v26 = vpop.f32.mrf.mxu0 }
 0x1c2   :  { %v318_v27 = vadd.f32 %v1408_v44, %v317_v26  ;;  %v791_v28 = vpack.c.bf16 %v737_v25, %v736_v23 }
 0x1c4   :  { %v424_v32 = vmax.f32 %v318_v27, 0.0  ;;  %931 = vmatmul.bf16.gmra.mxu2 %v791_v28 }
 0x1c5   :  { %v606_v34 = vpop.f32.mrf.mxu1 }
 0x1c6   :  { %v469_v35 = vpack.c.bf16 %v424_v32, %v423_v31  ;;  %v607_v45 = vadd.f32 %v1455_v30, %v606_v34  ;;  %v385_v34 = vpop.f32.mrf.mxu3 }
 0x1c7   :  { %v892_v37 = vpop.f32.mrf.mxu2  ;;  %v386_v38 = vadd.f32 %v1408_v44, %v385_v34 }
 0x1c8   :  { %v893_v40 = vadd.f32 %v1507_v33, %v892_v37  ;;  %645 = vmatmul.bf16.gmra.mxu1 %v469_v35  ;;  %v738_v50 = vmax.f32 %v607_v45, 0.0 }
 0x1c9   :  { %v320_v41 = vpop.f32.mrf.mxu0 }
 0x1ca   :  { %1052 = vst.msk [vmem:[%s1888_s7] sm:$0xff] %vm1051_vm0, %v893_v40  ;;  %v321_v51 = vadd.f32 %v1408_v44, %v320_v41  ;;  %v451_v41 = vmax.f32 %v386_v38, 0.0 }
 0x1cc   :  { %v425_v58 = vmax.f32 %v321_v51, 0.0  ;;  %v483_v45 = vpack.c.bf16 %v451_v41, %v451_v41 }
 0x1cd   :  { %v608_v46 = vpop.f32.mrf.mxu1 }
 0x1ce   :  { %v609_v47 = vadd.f32 %v1455_v30, %v608_v46  ;;  %v387_v48 = vpop.f32.mrf.mxu3  ;;  %715 = vmatmul.bf16.gmra.mxu3 %v483_v45 }
 0x1cf   :  { %v894_v49 = vpop.f32.mrf.mxu2 }
 0x1d0   :  { %v739_v52 = vmax.f32 %v609_v47, 0.0  ;;  %v895_v53 = vadd.f32 %v1507_v33, %v894_v49 }
 0x1d1   :  { %v322_v54 = vpop.f32.mrf.mxu0 }
 0x1d2   :  { %1053 = vst.msk [vmem:[%s1888_s7 + $0x8] sm:$0xff] %vm1051_vm0, %v895_v53  ;;  %v323_v55 = vadd.f32 %v1408_v44, %v322_v54  ;;  %v792_v56 = vpack.c.bf16 %v739_v52, %v738_v50 }
 0x1d4   :  { %v426_v59 = vmax.f32 %v323_v55, 0.0  ;;  %936 = vmatmul.bf16.gmra.mxu2 %v792_v56 }
 0x1d5   :  { %v611_v60 = vpop.f32.mrf.mxu1 }
 0x1d6   :  { %v470_v61 = vpack.c.bf16 %v426_v59, %v425_v58  ;;  %v612_v6 = vadd.f32 %v1455_v30, %v611_v60  ;;  %v681_v58 = vpop.f32.mrf.mxu3 }
 0x1d7   :  { %v897_v63 = vpop.f32.mrf.mxu2  ;;  %v682_v1 = vadd.f32 %v1455_v30, %v681_v58 }
 0x1d8   :  { %v898_v2 = vadd.f32 %v1507_v33, %v897_v63  ;;  %650 = vmatmul.bf16.gmra.mxu1 %v470_v61  ;;  %v740_v10 = vmax.f32 %v612_v6, 0.0 }
 0x1d9   :  { %v325_v3 = vpop.f32.mrf.mxu0 }
 0x1da   :  { %1054 = vst.msk [vmem:[%s1888_s7 + $0x10] sm:$0xff] %vm1051_vm0, %v898_v2  ;;  %v326_v11 = vadd.f32 %v1408_v44, %v325_v3 }
 0x1dc   :  { %v427_v17 = vmax.f32 %v326_v11, 0.0 }
 0x1dd   :  { %v613_v7 = vpop.f32.mrf.mxu1 }
 0x1de   :  { %v614_v8 = vadd.f32 %v1455_v30, %v613_v7  ;;  %v683_v5 = vpop.f32.mrf.mxu3  ;;  %v768_v7 = vmax.f32 %v682_v1, 0.0 }
 0x1df   :  { %v899_v9 = vpop.f32.mrf.mxu2 }
 0x1e0   :  { %v741_v12 = vmax.f32 %v614_v8, 0.0  ;;  %v900_v13 = vadd.f32 %v1507_v33, %v899_v9  ;;  %v684_v8 = vadd.f32 %v1455_v30, %v683_v5 }
 0x1e1   :  { %v327_v14 = vpop.f32.mrf.mxu0 }
 0x1e2   :  { %1055 = vst.msk [vmem:[%s1888_s7 + $0x18] sm:$0xff] %vm1051_vm0, %v900_v13  ;;  %v328_v15 = vadd.f32 %v1408_v44, %v327_v14  ;;  %v793_v16 = vpack.c.bf16 %v741_v12, %v740_v10  ;;  %v769_v9 = vmax.f32 %v684_v8, 0.0 }
 0x1e4   :  { %v428_v18 = vmax.f32 %v328_v15, 0.0  ;;  %941 = vmatmul.bf16.gmra.mxu2 %v793_v16  ;;  %v807_v12 = vpack.c.bf16 %v769_v9, %v768_v7 }
 0x1e5   :  { %v616_v19 = vpop.f32.mrf.mxu1 }
 0x1e6   :  { %v471_v20 = vpack.c.bf16 %v428_v18, %v427_v17  ;;  %v617_v24 = vadd.f32 %v1455_v30, %v616_v19  ;;  %1011 = vmatmul.bf16.vlgmr.msra.gmra.mxu3 %v807_v12 }
 0x1e7   :  { %v902_v21 = vpop.f32.mrf.mxu2 }
 0x1e8   :  { %v903_v22 = vadd.f32 %v1507_v33, %v902_v21  ;;  %655 = vmatmul.bf16.gmra.mxu1 %v471_v20  ;;  %v742_v28 = vmax.f32 %v617_v24, 0.0 }
 0x1e9   :  { %v330_v23 = vpop.f32.mrf.mxu0  ;;  %v686_v19 = vpop.f32.mrf.mxu3 }
 0x1ea   :  { %1056 = vst.msk [vmem:[%s1888_s7 + $0x20] sm:$0xff] %vm1051_vm0, %v903_v22  ;;  %v331_v29 = vadd.f32 %v1408_v44, %v330_v23 }
 0x1ec   :  { %v429_v39 = vmax.f32 %v331_v29, 0.0 }
 0x1ed   :  { %v618_v25 = vpop.f32.mrf.mxu1 }
 0x1ee   :  { %v619_v26 = vadd.f32 %v1455_v30, %v618_v25 }
 0x1ef   :  { %v904_v27 = vpop.f32.mrf.mxu2 }
 0x1f0   :  { %v743_v31 = vmax.f32 %v619_v26, 0.0  ;;  %v905_v32 = vadd.f32 %v1507_v33, %v904_v27  ;;  %v687_v26 = vadd.f32 %v1455_v30, %v686_v19 }
 0x1f1   :  { %v332_v35 = vpop.f32.mrf.mxu0 }
 0x1f2   :  { %1057 = vst.msk [vmem:[%s1888_s7 + $0x28] sm:$0xff] %vm1051_vm0, %v905_v32  ;;  %v333_v36 = vadd.f32 %v1408_v44, %v332_v35  ;;  %v794_v37 = vpack.c.bf16 %v743_v31, %v742_v28  ;;  %v688_v31 = vpop.f32.mrf.mxu3  ;;  %v770_v34 = vmax.f32 %v687_v26, 0.0 }
 0x1f3   :  { %v689_v35 = vadd.f32 %v1455_v30, %v688_v31 }
 0x1f4   :  { %v430_v40 = vmax.f32 %v333_v36, 0.0  ;;  %946 = vmatmul.bf16.gmra.mxu2 %v794_v37 }
 0x1f5   :  { %v621_v42 = vpop.f32.mrf.mxu1 }
 0x1f6   :  { %v472_v43 = vpack.c.bf16 %v430_v40, %v429_v39  ;;  %v622_v50 = vadd.f32 %v1455_v30, %v621_v42  ;;  %v1275_v42 = vld [vmem:[%s1883_s2] ss:$0 sm:$0xff] }
 0x1f7   :  { %v907_v46 = vpop.f32.mrf.mxu2 }
 0x1f8   :  { %v908_v47 = vadd.f32 %v1507_v33, %v907_v46  ;;  %660 = vmatmul.bf16.gmra.mxu1 %v472_v43  ;;  %v744_v54 = vmax.f32 %v622_v50, 0.0 }
 0x1f9   :  { %v335_v49 = vpop.f32.mrf.mxu0 }
 0x1fa   :  { %1058 = vst.msk [vmem:[%s1888_s7 + $0x30] sm:$0xff] %vm1051_vm0, %v908_v47  ;;  %v336_v55 = vadd.f32 %v1408_v44, %v335_v49 }
 0x1fb   :  { %v691_v47 = vpop.f32.mrf.mxu3 }
 0x1fc   :  { %v431_v62 = vmax.f32 %v336_v55, 0.0 }
 0x1fd   :  { %v623_v51 = vpop.f32.mrf.mxu1 }
 0x1fe   :  { %v624_v52 = vadd.f32 %v1455_v30, %v623_v51 }
 0x1ff   :  { %v909_v53 = vpop.f32.mrf.mxu2 }
 0x200   :  { %v745_v56 = vmax.f32 %v624_v52, 0.0  ;;  %v910_v57 = vadd.f32 %v1507_v33, %v909_v53 }
 0x201   :  { %v337_v59 = vpop.f32.mrf.mxu0 }
 0x202   :  { %v795_v60 = vpack.c.bf16 %v745_v56, %v744_v54  ;;  %1059 = vst.msk [vmem:[%s1888_s7 + $0x38] sm:$0xff] %vm1051_vm0, %v910_v57  ;;  %v338_v61 = vadd.f32 %v1408_v44, %v337_v59  ;;  %v692_v54 = vadd.f32 %v1455_v30, %v691_v47 }
 0x203   :  { %v693_v58 = vpop.f32.mrf.mxu3 }
 0x204   :  { %v432_v63 = vmax.f32 %v338_v61, 0.0  ;;  %951 = vmatmul.bf16.gmra.mxu2 %v795_v60  ;;  %v772_v59 = vmax.f32 %v692_v54, 0.0  ;;  %v694_v60 = vadd.f32 %v1455_v30, %v693_v58 }
 0x205   :  { %v626_v0 = vpop.f32.mrf.mxu1 }
 0x206   :  { %v473_v2 = vpack.c.bf16 %v432_v63, %v431_v62  ;;  %v627_v10 = vadd.f32 %v1455_v30, %v626_v0  ;;  %v773_v61 = vmax.f32 %v694_v60, 0.0 }
 0x207   :  { %v912_v3 = vpop.f32.mrf.mxu2 }
 0x208   :  { %v913_v4 = vadd.f32 %v1507_v33, %v912_v3  ;;  %665 = vmatmul.bf16.gmra.mxu1 %v473_v2  ;;  %v746_v15 = vmax.f32 %v627_v10, 0.0  ;;  %v809_v0 = vpack.c.bf16 %v773_v61, %v772_v59 }
 0x209   :  { %v340_v6 = vpop.f32.mrf.mxu0 }
 0x20a   :  { %1060 = vst.msk [vmem:[%s1888_s7 + $0x40] sm:$0xff] %vm1051_vm0, %v913_v4  ;;  %v341_v16 = vadd.f32 %v1408_v44, %v340_v6 }
 0x20b   :  { %v696_v6 = vpop.f32.mrf.mxu3 }
 0x20c   :  { %v433_v23 = vmax.f32 %v341_v16, 0.0  ;;  %v697_v9 = vadd.f32 %v1455_v30, %v696_v6 }
 0x20d   :  { %v628_v11 = vpop.f32.mrf.mxu1 }
 0x20e   :  { %v629_v13 = vadd.f32 %v1455_v30, %v628_v11 }
 0x20f   :  { %v914_v14 = vpop.f32.mrf.mxu2 }
 0x210   :  { %v747_v17 = vmax.f32 %v629_v13, 0.0  ;;  %v915_v18 = vadd.f32 %v1507_v33, %v914_v14  ;;  %v774_v13 = vmax.f32 %v697_v9, 0.0 }
 0x211   :  { %v342_v20 = vpop.f32.mrf.mxu0 }
 0x212   :  { %v796_v21 = vpack.c.bf16 %v747_v17, %v746_v15  ;;  %1061 = vst.msk [vmem:[%s1888_s7 + $0x48] sm:$0xff] %vm1051_vm0, %v915_v18  ;;  %v343_v22 = vadd.f32 %v1408_v44, %v342_v20  ;;  %v771_v44 = vmax.f32 %v689_v35, 0.0 }
 0x213   :  { %v698_v12 = vpop.f32.mrf.mxu3 }
 0x214   :  { %v434_v24 = vmax.f32 %v343_v22, 0.0  ;;  %956 = vmatmul.bf16.gmra.mxu2 %v796_v21  ;;  %v808_v38 = vpack.c.bf16 %v771_v44, %v770_v34  ;;  %v699_v14 = vadd.f32 %v1455_v30, %v698_v12 }
 0x215   :  { %v631_v25 = vpop.f32.mrf.mxu1 }
 0x216   :  { %v474_v27 = vpack.c.bf16 %v434_v24, %v433_v23  ;;  %v632_v36 = vadd.f32 %v1455_v30, %v631_v25  ;;  %1016 = vmatmul.bf16.gmra.mxu3 %v808_v38  ;;  %v775_v15 = vmax.f32 %v699_v14, 0.0 }
 0x217   :  { %v917_v28 = vpop.f32.mrf.mxu2 }
 0x218   :  { %v918_v29 = vadd.f32 %v1507_v33, %v917_v28  ;;  %670 = vmatmul.bf16.gmra.mxu1 %v474_v27  ;;  %v748_v41 = vmax.f32 %v632_v36, 0.0  ;;  %v810_v18 = vpack.c.bf16 %v775_v15, %v774_v13 }
 0x219   :  { %v345_v32 = vpop.f32.mrf.mxu0 }
 0x21a   :  { %1062 = vst.msk [vmem:[%s1888_s7 + $0x50] sm:$0xff] %vm1051_vm0, %v918_v29  ;;  %v346_v43 = vadd.f32 %v1275_v42, %v345_v32 }
 0x21b   :  { %v701_v24 = vpop.f32.mrf.mxu3 }
 0x21c   :  { %v435_v51 = vmax.f32 %v346_v43, 0.0  ;;  %v702_v27 = vadd.f32 %v1455_v30, %v701_v24 }
 0x21d   :  { %v633_v37 = vpop.f32.mrf.mxu1 }
 0x21e   :  { %v634_v39 = vadd.f32 %v1455_v30, %v633_v37  ;;  %v776_v32 = vmax.f32 %v702_v27, 0.0 }
 0x21f   :  { %v919_v40 = vpop.f32.mrf.mxu2 }
 0x220   :  { %v749_v45 = vmax.f32 %v634_v39, 0.0  ;;  %v920_v46 = vadd.f32 %v1507_v33, %v919_v40 }
 0x221   :  { %v347_v48 = vpop.f32.mrf.mxu0 }
 0x222   :  { %v797_v49 = vpack.c.bf16 %v749_v45, %v748_v41  ;;  %1063 = vst.msk [vmem:[%s1888_s7 + $0x58] sm:$0xff] %vm1051_vm0, %v920_v46  ;;  %v348_v50 = vadd.f32 %v1275_v42, %v347_v48 }
 0x223   :  { %v703_v31 = vpop.f32.mrf.mxu3 }
 0x224   :  { %v436_v52 = vmax.f32 %v348_v50, 0.0  ;;  %961 = vmatmul.bf16.gmra.mxu2 %v797_v49  ;;  %v704_v34 = vadd.f32 %v1455_v30, %v703_v31 }
 0x225   :  { %v636_v53 = vpop.f32.mrf.mxu1 }
 0x226   :  { %v475_v55 = vpack.c.bf16 %v436_v52, %v435_v51  ;;  %v637_v62 = vadd.f32 %v1455_v30, %v636_v53  ;;  %1021 = vmatmul.bf16.gmra.mxu3 %v809_v0  ;;  %v777_v35 = vmax.f32 %v704_v34, 0.0 }
 0x227   :  { %v922_v56 = vpop.f32.mrf.mxu2 }
 0x228   :  { %v923_v57 = vadd.f32 %v1507_v33, %v922_v56  ;;  %675 = vmatmul.bf16.gmra.mxu1 %v475_v55  ;;  %v750_v3 = vmax.f32 %v637_v62, 0.0  ;;  %v811_v37 = vpack.c.bf16 %v777_v35, %v776_v32 }
 0x22a   :  { %1064 = vst.msk [vmem:[%s1888_s7 + $0x60] sm:$0xff] %vm1051_vm0, %v923_v57 }
 0x22b   :  { %v706_v43 = vpop.f32.mrf.mxu3 }
 0x22c   :  { %v707_v47 = vadd.f32 %v1455_v30, %v706_v43 }
 0x22d   :  { %v638_v63 = vpop.f32.mrf.mxu1 }
 0x22e   :  { %v639_v1 = vadd.f32 %v1455_v30, %v638_v63  ;;  %v778_v51 = vmax.f32 %v707_v47, 0.0 }
 0x22f   :  { %v924_v2 = vpop.f32.mrf.mxu2 }
 0x230   :  { %v751_v4 = vmax.f32 %v639_v1, 0.0  ;;  %v925_v5 = vadd.f32 %v1507_v33, %v924_v2 }
 0x232   :  { %v798_v7 = vpack.c.bf16 %v751_v4, %v750_v3  ;;  %1065 = vst.msk [vmem:[%s1888_s7 + $0x68] sm:$0xff] %vm1051_vm0, %v925_v5 }
 0x233   :  { %v708_v50 = vpop.f32.mrf.mxu3 }
 0x234   :  { %966 = vmatmul.bf16.gmra.mxu2 %v798_v7  ;;  %v709_v52 = vadd.f32 %v1455_v30, %v708_v50 }
 0x235   :  { %v641_v8 = vpop.f32.mrf.mxu1 }
 0x236   :  { %v642_v16 = vadd.f32 %v1455_v30, %v641_v8  ;;  %1026 = vmatmul.bf16.gmra.mxu3 %v810_v18  ;;  %v779_v53 = vmax.f32 %v709_v52, 0.0 }
 0x237   :  { %v927_v10 = vpop.f32.mrf.mxu2 }
 0x238   :  { %v928_v11 = vadd.f32 %v1507_v33, %v927_v10  ;;  %v752_v21 = vmax.f32 %v642_v16, 0.0  ;;  %v812_v56 = vpack.c.bf16 %v779_v53, %v778_v51 }
 0x23a   :  { %1066 = vst.msk [vmem:[%s1888_s7 + $0x70] sm:$0xff] %vm1051_vm0, %v928_v11 }
 0x23b   :  { %v711_v62 = vpop.f32.mrf.mxu3 }
 0x23c   :  { %v712_v1 = vadd.f32 %v1455_v30, %v711_v62 }
 0x23d   :  { %v643_v17 = vpop.f32.mrf.mxu1 }
 0x23e   :  { %v644_v19 = vadd.f32 %v1455_v30, %v643_v17  ;;  %v780_v5 = vmax.f32 %v712_v1, 0.0 }
 0x23f   :  { %v929_v20 = vpop.f32.mrf.mxu2 }
 0x240   :  { %v753_v22 = vmax.f32 %v644_v19, 0.0  ;;  %v930_v23 = vadd.f32 %v1507_v33, %v929_v20 }
 0x242   :  { %v799_v25 = vpack.c.bf16 %v753_v22, %v752_v21  ;;  %1067 = vst.msk [vmem:[%s1888_s7 + $0x78] sm:$0xff] %vm1051_vm0, %v930_v23 }
 0x243   :  { %v713_v4 = vpop.f32.mrf.mxu3 }
 0x244   :  { %971 = vmatmul.bf16.gmra.mxu2 %v799_v25  ;;  %v714_v6 = vadd.f32 %v1455_v30, %v713_v4 }
 0x245   :  { %v646_v26 = vpop.f32.mrf.mxu1 }
 0x246   :  { %v647_v44 = vadd.f32 %v1455_v30, %v646_v26  ;;  %1031 = vmatmul.bf16.gmra.mxu3 %v811_v37  ;;  %v781_v7 = vmax.f32 %v714_v6, 0.0 }
 0x247   :  { %v932_v28 = vpop.f32.mrf.mxu2 }
 0x248   :  { %v933_v29 = vadd.f32 %v1507_v33, %v932_v28  ;;  %v754_v40 = vmax.f32 %v647_v44, 0.0  ;;  %v813_v10 = vpack.c.bf16 %v781_v7, %v780_v5 }
 0x24a   :  { %1068 = vst.msk [vmem:[%s1888_s7 + $0x80] sm:$0xff] %vm1051_vm0, %v933_v29  ;;  %v1276_v29 = vld [vmem:[%s1885_s4] ss:$0 sm:$0xff] }
 0x24d   :  { %v648_v36 = vpop.f32.mrf.mxu1 }
 0x24e   :  { %v649_v38 = vadd.f32 %v1455_v30, %v648_v36 }
 0x24f   :  { %v934_v39 = vpop.f32.mrf.mxu2 }
 0x250   :  { %v755_v41 = vmax.f32 %v649_v38, 0.0  ;;  %v935_v42 = vadd.f32 %v1507_v33, %v934_v39 }
 0x251   :  { %v716_v28 = vpop.f32.mrf.mxu3 }
 0x252   :  { %v800_v45 = vpack.c.bf16 %v755_v41, %v754_v40  ;;  %1069 = vst.msk [vmem:[%s1888_s7 + $0x88] sm:$0xff] %vm1051_vm0, %v935_v42  ;;  %v717_v31 = vadd.f32 %v1276_v29, %v716_v28 }
 0x254   :  { %976 = vmatmul.bf16.gmra.mxu2 %v800_v45 }
 0x255   :  { %v651_v46 = vpop.f32.mrf.mxu1 }
 0x256   :  { %v652_v54 = vadd.f32 %v1455_v30, %v651_v46  ;;  %1036 = vmatmul.bf16.gmra.mxu3 %v812_v56 }
 0x257   :  { %v937_v48 = vpop.f32.mrf.mxu2 }
 0x258   :  { %v938_v49 = vadd.f32 %v1507_v33, %v937_v48  ;;  %v756_v59 = vmax.f32 %v652_v54, 0.0 }
 0x259   :  { %v718_v36 = vpop.f32.mrf.mxu3 }
 0x25a   :  { %1070 = vst.msk [vmem:[%s1888_s7 + $0x90] sm:$0xff] %vm1051_vm0, %v938_v49 }
 0x25d   :  { %v653_v55 = vpop.f32.mrf.mxu1 }
 0x25e   :  { %v654_v57 = vadd.f32 %v1455_v30, %v653_v55 }
 0x25f   :  { %v939_v58 = vpop.f32.mrf.mxu2 }
 0x260   :  { %v757_v60 = vmax.f32 %v654_v57, 0.0  ;;  %v940_v61 = vadd.f32 %v1507_v33, %v939_v58 }
 0x262   :  { %v801_v63 = vpack.c.bf16 %v757_v60, %v756_v59  ;;  %1071 = vst.msk [vmem:[%s1888_s7 + $0x98] sm:$0xff] %vm1051_vm0, %v940_v61 }
 0x264   :  { %981 = vmatmul.bf16.gmra.mxu2 %v801_v63 }
 0x265   :  { %v656_v0 = vpop.f32.mrf.mxu1 }
 0x266   :  { %v657_v8 = vadd.f32 %v1455_v30, %v656_v0  ;;  %1041 = vmatmul.bf16.gmra.mxu3 %v813_v10 }
 0x267   :  { %v942_v2 = vpop.f32.mrf.mxu2 }
 0x268   :  { %v943_v3 = vadd.f32 %v1507_v33, %v942_v2  ;;  %v758_v13 = vmax.f32 %v657_v8, 0.0 }
 0x269   :  { %v1012_v46 = vpop.f32.mrf.mxu3 }
 0x26a   :  { %1072 = vst.msk [vmem:[%s1888_s7 + $0xa0] sm:$0xff] %vm1051_vm0, %v943_v3  ;;  %v1013_v47 = vadd.f32 %v1507_v33, %v1012_v46 }
 0x26c   :  { %1100 = vst.msk [vmem:[%s1888_s7 + $0x180] sm:$0xff] %vm1051_vm0, %v1013_v47 }
 0x26d   :  { %v658_v9 = vpop.f32.mrf.mxu1 }
 0x26e   :  { %v659_v11 = vadd.f32 %v1455_v30, %v658_v9 }
 0x26f   :  { %v944_v12 = vpop.f32.mrf.mxu2 }
 0x270   :  { %v759_v14 = vmax.f32 %v659_v11, 0.0  ;;  %v945_v15 = vadd.f32 %v1507_v33, %v944_v12 }
 0x271   :  { %v1014_v51 = vpop.f32.mrf.mxu3 }
 0x272   :  { %v802_v16 = vpack.c.bf16 %v759_v14, %v758_v13  ;;  %1073 = vst.msk [vmem:[%s1888_s7 + $0xa8] sm:$0xff] %vm1051_vm0, %v945_v15  ;;  %v1015_v52 = vadd.f32 %v1507_v33, %v1014_v51 }
 0x274   :  { %986 = vmatmul.bf16.gmra.mxu2 %v802_v16  ;;  %1101 = vst.msk [vmem:[%s1888_s7 + $0x188] sm:$0xff] %vm1051_vm0, %v1015_v52 }
 0x275   :  { %v661_v17 = vpop.f32.mrf.mxu1 }
 0x276   :  { %v662_v20 = vadd.f32 %v1455_v30, %v661_v17 }
 0x277   :  { %v947_v18 = vpop.f32.mrf.mxu2 }
 0x278   :  { %v948_v19 = vadd.f32 %v1507_v33, %v947_v18  ;;  %v760_v24 = vmax.f32 %v662_v20, 0.0 }
 0x27a   :  { %1074 = vst.msk [vmem:[%s1888_s7 + $0xb0] sm:$0xff] %vm1051_vm0, %v948_v19 }
 0x27d   :  { %v663_v21 = vpop.f32.mrf.mxu1 }
 0x27e   :  { %v664_v22 = vadd.f32 %v1455_v30, %v663_v21  ;;  %v782_v30 = vmax.f32 %v717_v31, 0.0 }
 0x27f   :  { %v949_v23 = vpop.f32.mrf.mxu2 }
 0x280   :  { %v761_v25 = vmax.f32 %v664_v22, 0.0  ;;  %v950_v26 = vadd.f32 %v1507_v33, %v949_v23  ;;  %v814_v35 = vpack.c.bf16 %v782_v30, %v782_v30 }
 0x282   :  { %v803_v27 = vpack.c.bf16 %v761_v25, %v760_v24  ;;  %1075 = vst.msk [vmem:[%s1888_s7 + $0xb8] sm:$0xff] %vm1051_vm0, %v950_v26  ;;  %1046 = vmatmul.bf16.gmra.mxu3 %v814_v35 }
 0x284   :  { %991 = vmatmul.bf16.gmra.mxu2 %v803_v27 }
 0x285   :  { %v666_v32 = vpop.f32.mrf.mxu1 }
 0x286   :  { %v667_v37 = vadd.f32 %v1276_v29, %v666_v32 }
 0x287   :  { %v952_v34 = vpop.f32.mrf.mxu2 }
 0x288   :  { %v953_v44 = vadd.f32 %v1507_v33, %v952_v34  ;;  %v762_v41 = vmax.f32 %v667_v37, 0.0 }
 0x28a   :  { %1076 = vst.msk [vmem:[%s1888_s7 + $0xc0] sm:$0xff] %vm1051_vm0, %v953_v44 }
 0x28d   :  { %v668_v38 = vpop.f32.mrf.mxu1 }
 0x28e   :  { %v669_v39 = vadd.f32 %v1276_v29, %v668_v38 }
 0x28f   :  { %v954_v40 = vpop.f32.mrf.mxu2 }
 0x290   :  { %v763_v42 = vmax.f32 %v669_v39, 0.0  ;;  %v955_v43 = vadd.f32 %v1507_v33, %v954_v40 }
 0x292   :  { %v804_v45 = vpack.c.bf16 %v763_v42, %v762_v41  ;;  %1077 = vst.msk [vmem:[%s1888_s7 + $0xc8] sm:$0xff] %vm1051_vm0, %v955_v43 }
 0x294   :  { %996 = vmatmul.bf16.gmra.mxu2 %v804_v45 }
 0x295   :  { %v671_v48 = vpop.f32.mrf.mxu1 }
 0x296   :  { %v672_v53 = vadd.f32 %v1276_v29, %v671_v48 }
 0x297   :  { %v957_v49 = vpop.f32.mrf.mxu2 }
 0x298   :  { %v958_v50 = vadd.f32 %v1507_v33, %v957_v49  ;;  %v764_v57 = vmax.f32 %v672_v53, 0.0 }
 0x299   :  { %v1017_v61 = vpop.f32.mrf.mxu3 }
 0x29a   :  { %1078 = vst.msk [vmem:[%s1888_s7 + $0xd0] sm:$0xff] %vm1051_vm0, %v958_v50  ;;  %v1018_v62 = vadd.f32 %v1507_v33, %v1017_v61 }
 0x29c   :  { %1102 = vst.msk [vmem:[%s1888_s7 + $0x190] sm:$0xff] %vm1051_vm0, %v1018_v62 }
 0x29d   :  { %v673_v54 = vpop.f32.mrf.mxu1 }
 0x29e   :  { %v674_v55 = vadd.f32 %v1276_v29, %v673_v54 }
 0x29f   :  { %v959_v56 = vpop.f32.mrf.mxu2 }
 0x2a0   :  { %v765_v58 = vmax.f32 %v674_v55, 0.0  ;;  %v960_v59 = vadd.f32 %v1507_v33, %v959_v56 }
 0x2a1   :  { %v1019_v2 = vpop.f32.mrf.mxu3 }
 0x2a2   :  { %v805_v60 = vpack.c.bf16 %v765_v58, %v764_v57  ;;  %1079 = vst.msk [vmem:[%s1888_s7 + $0xd8] sm:$0xff] %vm1051_vm0, %v960_v59  ;;  %v1020_v3 = vadd.f32 %v1507_v33, %v1019_v2 }
 0x2a4   :  { %1001 = vmatmul.bf16.gmra.mxu2 %v805_v60  ;;  %1103 = vst.msk [vmem:[%s1888_s7 + $0x198] sm:$0xff] %vm1051_vm0, %v1020_v3 }
 0x2a5   :  { %v676_v63 = vpop.f32.mrf.mxu1 }
 0x2a6   :  { %v677_v4 = vadd.f32 %v1276_v29, %v676_v63 }
 0x2a7   :  { %v962_v0 = vpop.f32.mrf.mxu2 }
 0x2a8   :  { %v963_v1 = vadd.f32 %v1507_v33, %v962_v0  ;;  %v766_v8 = vmax.f32 %v677_v4, 0.0 }
 0x2a9   :  { %v1022_v12 = vpop.f32.mrf.mxu3 }
 0x2aa   :  { %1080 = vst.msk [vmem:[%s1888_s7 + $0xe0] sm:$0xff] %vm1051_vm0, %v963_v1  ;;  %v1023_v13 = vadd.f32 %v1507_v33, %v1022_v12 }
 0x2ac   :  { %1104 = vst.msk [vmem:[%s1888_s7 + $0x1a0] sm:$0xff] %vm1051_vm0, %v1023_v13 }
 0x2ad   :  { %v678_v5 = vpop.f32.mrf.mxu1 }
 0x2ae   :  { %v679_v6 = vadd.f32 %v1276_v29, %v678_v5 }
 0x2af   :  { %v964_v7 = vpop.f32.mrf.mxu2 }
 0x2b0   :  { %v767_v9 = vmax.f32 %v679_v6, 0.0  ;;  %v965_v10 = vadd.f32 %v1507_v33, %v964_v7 }
 0x2b1   :  { %v1024_v16 = vpop.f32.mrf.mxu3 }
 0x2b2   :  { %v806_v11 = vpack.c.bf16 %v767_v9, %v766_v8  ;;  %1081 = vst.msk [vmem:[%s1888_s7 + $0xe8] sm:$0xff] %vm1051_vm0, %v965_v10  ;;  %v1025_v17 = vadd.f32 %v1507_v33, %v1024_v16 }
 0x2b4   :  { %1006 = vmatmul.bf16.gmra.mxu2 %v806_v11  ;;  %1105 = vst.msk [vmem:[%s1888_s7 + $0x1a8] sm:$0xff] %vm1051_vm0, %v1025_v17 }
 0x2b7   :  { %v967_v14 = vpop.f32.mrf.mxu2 }
 0x2b8   :  { %v968_v15 = vadd.f32 %v1507_v33, %v967_v14 }
 0x2b9   :  { %v1027_v20 = vpop.f32.mrf.mxu3 }
 0x2ba   :  { %1082 = vst.msk [vmem:[%s1888_s7 + $0xf0] sm:$0xff] %vm1051_vm0, %v968_v15  ;;  %v1028_v21 = vadd.f32 %v1507_v33, %v1027_v20 }
 0x2bc   :  { %1106 = vst.msk [vmem:[%s1888_s7 + $0x1b0] sm:$0xff] %vm1051_vm0, %v1028_v21 }
 0x2bf   :  { %v969_v18 = vpop.f32.mrf.mxu2 }
 0x2c0   :  { %v970_v19 = vadd.f32 %v1507_v33, %v969_v18 }
 0x2c1   :  { %v1029_v24 = vpop.f32.mrf.mxu3 }
 0x2c2   :  { %1083 = vst.msk [vmem:[%s1888_s7 + $0xf8] sm:$0xff] %vm1051_vm0, %v970_v19  ;;  %v1030_v25 = vadd.f32 %v1507_v33, %v1029_v24 }
 0x2c4   :  { %1107 = vst.msk [vmem:[%s1888_s7 + $0x1b8] sm:$0xff] %vm1051_vm0, %v1030_v25 }
 0x2c7   :  { %v972_v22 = vpop.f32.mrf.mxu2 }
 0x2c8   :  { %v973_v23 = vadd.f32 %v1507_v33, %v972_v22 }
 0x2c9   :  { %v1032_v28 = vpop.f32.mrf.mxu3 }
 0x2ca   :  { %1084 = vst.msk [vmem:[%s1888_s7 + $0x100] sm:$0xff] %vm1051_vm0, %v973_v23  ;;  %v1033_v29 = vadd.f32 %v1507_v33, %v1032_v28 }
 0x2cc   :  { %1108 = vst.msk [vmem:[%s1888_s7 + $0x1c0] sm:$0xff] %vm1051_vm0, %v1033_v29 }
 0x2cf   :  { %v974_v26 = vpop.f32.mrf.mxu2 }
 0x2d0   :  { %v975_v27 = vadd.f32 %v1507_v33, %v974_v26 }
 0x2d1   :  { %v1034_v30 = vpop.f32.mrf.mxu3 }
 0x2d2   :  { %1085 = vst.msk [vmem:[%s1888_s7 + $0x108] sm:$0xff] %vm1051_vm0, %v975_v27  ;;  %v1035_v34 = vadd.f32 %v1507_v33, %v1034_v30 }
 0x2d4   :  { %1109 = vst.msk [vmem:[%s1888_s7 + $0x1c8] sm:$0xff] %vm1051_vm0, %v1035_v34 }
 0x2d7   :  { %v977_v31 = vpop.f32.mrf.mxu2 }
 0x2d8   :  { %v978_v32 = vadd.f32 %v1507_v33, %v977_v31 }
 0x2d9   :  { %v1037_v36 = vpop.f32.mrf.mxu3 }
 0x2da   :  { %1086 = vst.msk [vmem:[%s1888_s7 + $0x110] sm:$0xff] %vm1051_vm0, %v978_v32  ;;  %v1038_v37 = vadd.f32 %v1507_v33, %v1037_v36 }
 0x2dc   :  { %1110 = vst.msk [vmem:[%s1888_s7 + $0x1d0] sm:$0xff] %vm1051_vm0, %v1038_v37 }
 0x2df   :  { %v979_v35 = vpop.f32.mrf.mxu2 }
 0x2e0   :  { %v980_v44 = vadd.f32 %v1507_v33, %v979_v35 }
 0x2e1   :  { %v1039_v40 = vpop.f32.mrf.mxu3 }
 0x2e2   :  { %1087 = vst.msk [vmem:[%s1888_s7 + $0x118] sm:$0xff] %vm1051_vm0, %v980_v44  ;;  %v1040_v41 = vadd.f32 %v1507_v33, %v1039_v40 }
 0x2e4   :  { %1111 = vst.msk [vmem:[%s1888_s7 + $0x1d8] sm:$0xff] %vm1051_vm0, %v1040_v41 }
 0x2e7   :  { %v982_v38 = vpop.f32.mrf.mxu2 }
 0x2e8   :  { %v983_v39 = vadd.f32 %v1507_v33, %v982_v38 }
 0x2e9   :  { %v1042_v45 = vpop.f32.mrf.mxu3 }
 0x2ea   :  { %1088 = vst.msk [vmem:[%s1888_s7 + $0x120] sm:$0xff] %vm1051_vm0, %v983_v39  ;;  %v1043_v46 = vadd.f32 %v1507_v33, %v1042_v45 }
 0x2ec   :  { %1112 = vst.msk [vmem:[%s1888_s7 + $0x1e0] sm:$0xff] %vm1051_vm0, %v1043_v46 }
 0x2ef   :  { %v984_v42 = vpop.f32.mrf.mxu2 }
 0x2f0   :  { %v985_v43 = vadd.f32 %v1507_v33, %v984_v42 }
 0x2f1   :  { %v1044_v49 = vpop.f32.mrf.mxu3 }
 0x2f2   :  { %1089 = vst.msk [vmem:[%s1888_s7 + $0x128] sm:$0xff] %vm1051_vm0, %v985_v43  ;;  %v1045_v50 = vadd.f32 %v1507_v33, %v1044_v49 }
 0x2f4   :  { %1113 = vst.msk [vmem:[%s1888_s7 + $0x1e8] sm:$0xff] %vm1051_vm0, %v1045_v50 }
 0x2f7   :  { %v987_v47 = vpop.f32.mrf.mxu2 }
 0x2f8   :  { %v988_v48 = vadd.f32 %v1507_v33, %v987_v47 }
 0x2fa   :  { %1090 = vst.msk [vmem:[%s1888_s7 + $0x130] sm:$0xff] %vm1051_vm0, %v988_v48 }
 0x2ff   :  { %v989_v51 = vpop.f32.mrf.mxu2 }
 0x300   :  { %v990_v52 = vadd.f32 %v1507_v33, %v989_v51 }
 0x302   :  { %1091 = vst.msk [vmem:[%s1888_s7 + $0x138] sm:$0xff] %vm1051_vm0, %v990_v52 }
 0x305   :  { %v1047_v57 = vpop.f32.mrf.mxu3 }
 0x306   :  { %v1048_v58 = vadd.f32 %v1507_v33, %v1047_v57 }
 0x307   :  { %v992_v53 = vpop.f32.mrf.mxu2 }
 0x308   :  { %v993_v54 = vadd.f32 %v1507_v33, %v992_v53  ;;  %1115 = vst.msk [vmem:[%s1888_s7 + $0x1f0] sm:$0xf] %vm1114_vm1, %v1048_v58 }
 0x30a   :  { %1092 = vst.msk [vmem:[%s1888_s7 + $0x140] sm:$0xff] %vm1051_vm0, %v993_v54 }
 0x30d   :  { %v1049_v61 = vpop.f32.mrf.mxu3 }
 0x30f   :  { %v994_v55 = vpop.f32.mrf.mxu2 }
 0x310   :  { %v995_v56 = vadd.f32 %v1507_v33, %v994_v55 }
 0x312   :  { %1093 = vst.msk [vmem:[%s1888_s7 + $0x148] sm:$0xff] %vm1051_vm0, %v995_v56 }
 0x317   :  { %v997_v59 = vpop.f32.mrf.mxu2 }
 0x318   :  { %v998_v60 = vadd.f32 %v1507_v33, %v997_v59 }
 0x31a   :  { %1094 = vst.msk [vmem:[%s1888_s7 + $0x150] sm:$0xff] %vm1051_vm0, %v998_v60 }
 0x31f   :  { %v999_v62 = vpop.f32.mrf.mxu2 }
 0x320   :  { %v1000_v63 = vadd.f32 %v1507_v33, %v999_v62 }
 0x322   :  { %1095 = vst.msk [vmem:[%s1888_s7 + $0x158] sm:$0xff] %vm1051_vm0, %v1000_v63 }
 0x327   :  { %v1002_v0 = vpop.f32.mrf.mxu2 }
 0x328   :  { %v1003_v1 = vadd.f32 %v1507_v33, %v1002_v0 }
 0x32a   :  { %1096 = vst.msk [vmem:[%s1888_s7 + $0x160] sm:$0xff] %vm1051_vm0, %v1003_v1 }
 0x32f   :  { %v1004_v2 = vpop.f32.mrf.mxu2 }
 0x330   :  { %v1005_v3 = vadd.f32 %v1507_v33, %v1004_v2 }
 0x332   :  { %1097 = vst.msk [vmem:[%s1888_s7 + $0x168] sm:$0xff] %vm1051_vm0, %v1005_v3 }
 0x337   :  { %v1007_v4 = vpop.f32.mrf.mxu2 }
 0x338   :  { %v1008_v5 = vadd.f32 %v1507_v33, %v1007_v4 }
 0x33a   :  { %1098 = vst.msk [vmem:[%s1888_s7 + $0x170] sm:$0xff] %vm1051_vm0, %v1008_v5 }
 0x33f   :  { %v1009_v6 = vpop.f32.mrf.mxu2 }
 0x340   :  { %v1010_v7 = vadd.f32 %v1507_v33, %v1009_v6 }
 0x342   :  { %1099 = vst.msk [vmem:[%s1888_s7 + $0x178] sm:$0xff] %vm1051_vm0, %v1010_v7 }
 0x343   :  { %1120 = vsyncpa [#allocation3], 1 }
 0x344   :  { %1121 = vsyncpa [#allocation5], 1 }

</bundles_post_ra>
